<compile_context>
chip_gen: v6e
topology: v6e:2x2x1
jax: 0.10.0
libtpu: 0.0.40
codegen_flags: <defaults>
</compile_context>

<pallas_src>
import math
import functools

import jax
import jax.numpy as jnp
from jax import lax
from jax.experimental import pallas as pl
from jax.experimental.pallas import tpu as pltpu

# ---- small synthetic config -------------------------------------------------
VOCAB = 64          # config.vocab_size
BLOCK_SIZE = 16     # config.block_size
N_EMBD = 32         # config.num_embeddings
N_HEAD = 4          # config.num_heads
N_LAYER = 2         # config.num_layers
EPS = 1e-5          # nn.LayerNorm default eps


def _round_up(x, m):
    return ((x + m - 1) // m) * m


VOCAB_PAD = _round_up(VOCAB, 128)   # lane-dense logits (zero-padded columns)


# ---- shared math (used inside the kernel and in the pure-JAX reference) -----
def _layernorm(v, w, b):
    mu = jnp.mean(v, axis=-1, keepdims=True)
    var = jnp.mean((v - mu) ** 2, axis=-1, keepdims=True)
    return (v - mu) * lax.rsqrt(var + EPS) * w + b


def _new_gelu(x):
    # x*x*x instead of jnp.power(x, 3.0): two VPU muls, keeps the EUP slot free
    # for the tanh.
    return 0.5 * x * (1.0 + jnp.tanh(
        math.sqrt(2.0 / math.pi) * (x + 0.044715 * (x * x * x))))


# ---- fused forward kernel ----------------------------------------------------
def gpt_kernel(x_ref,
               ln1w, ln1b, wqkv, bqkv, wproj, bproj,
               ln2w, ln2b, wfc, bfc, wfc2, bfc2,
               lnfw, lnfb, wlm,
               o_ref, x_sc,
               *, num_heads, num_layers, batch_tile, seq_len):
    """Grid = (batch_block, layer).  One step = one transformer Block applied
    to `batch_tile` full sequences; the residual stream is carried in x_sc.
    The final LayerNorm + lm_head runs after the last layer."""
    layer = pl.program_id(1)
    R, C = x_sc.shape            # R = batch_tile * seq_len (rows folded into M)
    T = seq_len
    HD = C // num_heads
    bf16 = jnp.bfloat16
    f32 = jnp.float32

    # Load the embeddings into the resident VMEM accumulator once per batch
    # block (layer == 0).
    @pl.when(layer == 0)
    def _():
        x_sc[...] = x_ref[...]

    x = x_sc[...]                                             # (R, C) f32

    # ---- attention branch: LN1 + fused QKV projection ----
    h = _layernorm(x, ln1w[0], ln1b[0])
    qkv = jnp.dot(h.astype(bf16), wqkv[0],
                  preferred_element_type=f32) + bqkv[0]        # (R, 3C) f32

    row = lax.broadcasted_iota(jnp.int32, (T, T), 0)
    col = lax.broadcasted_iota(jnp.int32, (T, T), 1)
    causal = col <= row                                        # tril incl. diag
    scale = 1.0 / math.sqrt(HD)

    # Unrolled (batch, head) loop over contiguous lane slices of qkv — no 3-D
    # reshapes / transposes.
    y_batches = []
    for b in range(batch_tile):
        r0 = b * T
        heads = []
        for hh in range(num_heads):
            c0 = hh * HD
            q = qkv[r0:r0 + T, c0:c0 + HD].astype(bf16)              # (T, HD)
            k = qkv[r0:r0 + T, C + c0:C + c0 + HD].astype(bf16)      # (T, HD)
            v = qkv[r0:r0 + T, 2 * C + c0:2 * C + c0 + HD].astype(bf16)
            # scores: contract over HD without materializing k.T
            s = lax.dot_general(q, k, (((1,), (1,)), ((), ())),
                                preferred_element_type=f32) * scale  # (T, T)
            s = jnp.where(causal, s, -1e30)
            s = s - jnp.max(s, axis=-1, keepdims=True)
            p = jnp.exp(s)
            p = p * pl.reciprocal(jnp.sum(p, axis=-1, keepdims=True),
                                  approx=True)
            heads.append(jnp.dot(p.astype(bf16), v,
                                 preferred_element_type=f32))        # (T, HD)
        y_batches.append(jnp.concatenate(heads, axis=1))             # (T, C)
    y = jnp.concatenate(y_batches, axis=0)                           # (R, C)

    attn_out = jnp.dot(y.astype(bf16), wproj[0],
                       preferred_element_type=f32) + bproj[0]
    x1 = x + attn_out

    # ---- MLP branch: LN2 + fc + new_gelu + proj ----
    h2 = _layernorm(x1, ln2w[0], ln2b[0])
    fc = jnp.dot(h2.astype(bf16), wfc[0],
                 preferred_element_type=f32) + bfc[0]                # (R, 4C)
    g = _new_gelu(fc)
    mlp_out = jnp.dot(g.astype(bf16), wfc2[0],
                      preferred_element_type=f32) + bfc2[0]

    x_new = x1 + mlp_out
    x_sc[...] = x_new

    # ---- final LayerNorm + lm_head (lane-dense, VOCAB padded to 128) ----
    @pl.when(layer == num_layers - 1)
    def _():
        hf = _layernorm(x_new, lnfw[...], lnfb[...])
        o_ref[...] = jnp.dot(hf.astype(bf16), wlm[...],
                             preferred_element_type=f32)             # (R, 128)


# ---- wrapper -----------------------------------------------------------------
def nanogpt_forward(params, idx):
    B, T = idx.shape
    assert T <= BLOCK_SIZE
    C = N_EMBD
    L = N_LAYER
    VP = params['wlm'].shape[1]

    # Embedding gathers + positional add stay in plain JAX (dropout = identity).
    tok_emb = params['wte'][idx]                     # (B, T, C)
    pos_emb = params['wpe'][:T][None]                # (1, T, C)
    x = (tok_emb + pos_emb).reshape(B * T, C)        # fold batch into M

    # At toy sizes fold the whole batch into one block (max M fill); at real
    # sizes pick batch_tile < B so the leading "parallel" axis shards across
    # v7x's two TensorCores.
    batch_tile = B
    num_bb = B // batch_tile
    R = batch_tile * T

    def layer_map(bb, l):
        return (l, 0, 0)

    def const_map(bb, l):
        return (0, 0)

    in_specs = [
        pl.BlockSpec((R, C), lambda bb, l: (bb, 0)),       # x (read at l==0)
        pl.BlockSpec((1, 1, C), layer_map),                # ln1w
        pl.BlockSpec((1, 1, C), layer_map),                # ln1b
        pl.BlockSpec((1, C, 3 * C), layer_map),            # wqkv
        pl.BlockSpec((1, 1, 3 * C), layer_map),            # bqkv
        pl.BlockSpec((1, C, C), layer_map),                # wproj
        pl.BlockSpec((1, 1, C), layer_map),                # bproj
        pl.BlockSpec((1, 1, C), layer_map),                # ln2w
        pl.BlockSpec((1, 1, C), layer_map),                # ln2b
        pl.BlockSpec((1, C, 4 * C), layer_map),            # wfc
        pl.BlockSpec((1, 1, 4 * C), layer_map),            # bfc
        pl.BlockSpec((1, 4 * C, C), layer_map),            # wfc2
        pl.BlockSpec((1, 1, C), layer_map),                # bfc2
        pl.BlockSpec((1, C), const_map),                   # lnfw
        pl.BlockSpec((1, C), const_map),                   # lnfb
        pl.BlockSpec((C, VP), const_map),                  # wlm (padded)
    ]

    kernel = functools.partial(gpt_kernel, num_heads=N_HEAD, num_layers=L,
                               batch_tile=batch_tile, seq_len=T)

    logits_pad = pl.pallas_call(
        kernel,
        out_shape=jax.ShapeDtypeStruct((B * T, VP), jnp.float32),
        grid=(num_bb, L),
        in_specs=in_specs,
        out_specs=pl.BlockSpec((R, VP), lambda bb, l: (bb, 0)),
        scratch_shapes=[pltpu.VMEM((R, C), jnp.float32)],   # resident residual
        compiler_params=pltpu.CompilerParams(
            dimension_semantics=("parallel", "arbitrary")),
    )(x,
      params['ln1w'], params['ln1b'], params['wqkv'], params['bqkv'],
      params['wproj'], params['bproj'], params['ln2w'], params['ln2b'],
      params['wfc'], params['bfc'], params['wfc2'], params['bfc2'],
      params['lnfw'], params['lnfb'], params['wlm'])

    return logits_pad[:, :VOCAB].reshape(B, T, VOCAB)


# ---- deterministic parameter init --------------------------------------------
def init_params(key):
    C = N_EMBD

    def normal(k, shape, std=0.02):
        return jax.random.normal(k, shape, jnp.float32) * std

    keys = jax.random.split(key, 3 + N_LAYER)

    # lm_head: zero-pad vocab columns to a multiple of 128 for lane-dense store.
    wlm = jnp.zeros((C, VOCAB_PAD), jnp.float32)
    wlm = wlm.at[:, :VOCAB].set(normal(keys[2], (C, VOCAB)))

    params = {
        'wte': normal(keys[0], (VOCAB, C)),
        'wpe': normal(keys[1], (BLOCK_SIZE, C)),
        'lnfw': jnp.ones((1, C), jnp.float32),
        'lnfb': jnp.zeros((1, C), jnp.float32),
        'wlm': wlm.astype(jnp.bfloat16),
    }

    wqkv, bqkv, wproj, bproj = [], [], [], []
    wfc, bfc, wfc2, bfc2 = [], [], [], []
    for i in range(N_LAYER):
        k = jax.random.split(keys[3 + i], 8)
        wqkv.append(normal(k[0], (C, 3 * C)))
        bqkv.append(normal(k[1], (1, 3 * C)))
        wproj.append(normal(k[2], (C, C)))
        bproj.append(normal(k[3], (1, C)))
        wfc.append(normal(k[4], (C, 4 * C)))
        bfc.append(normal(k[5], (1, 4 * C)))
        wfc2.append(normal(k[6], (4 * C, C)))
        bfc2.append(normal(k[7], (1, C)))

    params.update(
        ln1w=jnp.ones((N_LAYER, 1, C), jnp.float32),
        ln1b=jnp.zeros((N_LAYER, 1, C), jnp.float32),
        ln2w=jnp.ones((N_LAYER, 1, C), jnp.float32),
        ln2b=jnp.zeros((N_LAYER, 1, C), jnp.float32),
        wqkv=jnp.stack(wqkv).astype(jnp.bfloat16),   # (L, C, 3C)  bf16 for MXU
        bqkv=jnp.stack(bqkv),                        # (L, 1, 3C)  f32
        wproj=jnp.stack(wproj).astype(jnp.bfloat16),
        bproj=jnp.stack(bproj),
        wfc=jnp.stack(wfc).astype(jnp.bfloat16),
        bfc=jnp.stack(bfc),
        wfc2=jnp.stack(wfc2).astype(jnp.bfloat16),
        bfc2=jnp.stack(bfc2),
    )
    return params


# ---- pure-JAX f32 reference (mirrors the PyTorch forward) ---------------------
def reference_forward(params, idx):
    B, T = idx.shape
    C = N_EMBD
    HD = C // N_HEAD
    x = params['wte'][idx] + params['wpe'][:T][None]
    mask = jnp.tril(jnp.ones((T, T), bool))
    for l in range(N_LAYER):
        h = _layernorm(x, params['ln1w'][l, 0], params['ln1b'][l, 0])
        qkv = h @ params['wqkv'][l].astype(jnp.float32) + params['bqkv'][l, 0]
        q, k, v = jnp.split(qkv, 3, axis=-1)
        q = q.reshape(B, T, N_HEAD, HD).transpose(0, 2, 1, 3)
        k = k.reshape(B, T, N_HEAD, HD).transpose(0, 2, 1, 3)
        v = v.reshape(B, T, N_HEAD, HD).transpose(0, 2, 1, 3)
        att = (q @ k.transpose(0, 1, 3, 2)) * (1.0 / math.sqrt(HD))
        att = jnp.where(mask, att, -jnp.inf)
        att = jax.nn.softmax(att, axis=-1)
        y = (att @ v).transpose(0, 2, 1, 3).reshape(B, T, C)
        x = x + (y @ params['wproj'][l].astype(jnp.float32)
                 + params['bproj'][l, 0])
        h2 = _layernorm(x, params['ln2w'][l, 0], params['ln2b'][l, 0])
        x = x + (_new_gelu(h2 @ params['wfc'][l].astype(jnp.float32)
                           + params['bfc'][l, 0])
                 @ params['wfc2'][l].astype(jnp.float32) + params['bfc2'][l, 0])
    h = _layernorm(x, params['lnfw'][0], params['lnfb'][0])
    return h @ params['wlm'][:, :VOCAB].astype(jnp.float32)


if __name__ == "__main__":
    key = jax.random.PRNGKey(0)
    pkey, ikey = jax.random.split(key)
    params = init_params(pkey)

    B, T = 2, 8
    idx = jax.random.randint(ikey, (B, T), 0, VOCAB, dtype=jnp.int32)

    logits = jax.block_until_ready(nanogpt_forward(params, idx))
    assert logits.shape == (B, T, VOCAB)

    ref = reference_forward(params, idx)
    max_err = float(jnp.max(jnp.abs(logits - ref)))
    assert jnp.allclose(logits, ref, atol=2e-2, rtol=2e-2), \
        f"mismatch vs reference (max abs err {max_err})"

    print("KERNEL_OK")
</pallas_src>

<mosaic_0001>
module attributes {stable_mosaic.version = 11 : i64} {
  func.func @gpt_kernel(%arg0: i32, %arg1: i32, %arg2: memref<16x32xf32, #tpu.memory_space<vmem>>, %arg3: memref<1x1x32xf32, #tpu.memory_space<vmem>>, %arg4: memref<1x1x32xf32, #tpu.memory_space<vmem>>, %arg5: memref<1x32x96xbf16, #tpu.memory_space<vmem>>, %arg6: memref<1x1x96xf32, #tpu.memory_space<vmem>>, %arg7: memref<1x32x32xbf16, #tpu.memory_space<vmem>>, %arg8: memref<1x1x32xf32, #tpu.memory_space<vmem>>, %arg9: memref<1x1x32xf32, #tpu.memory_space<vmem>>, %arg10: memref<1x1x32xf32, #tpu.memory_space<vmem>>, %arg11: memref<1x32x128xbf16, #tpu.memory_space<vmem>>, %arg12: memref<1x1x128xf32, #tpu.memory_space<vmem>>, %arg13: memref<1x128x32xbf16, #tpu.memory_space<vmem>>, %arg14: memref<1x1x32xf32, #tpu.memory_space<vmem>>, %arg15: memref<1x32xf32, #tpu.memory_space<vmem>>, %arg16: memref<1x32xf32, #tpu.memory_space<vmem>>, %arg17: memref<32x128xbf16, #tpu.memory_space<vmem>>, %arg18: memref<16x128xf32, #tpu.memory_space<vmem>>, %arg19: memref<16x32xf32, #tpu.memory_space<vmem>>) attributes {dimension_semantics = [#tpu.dimension_semantics<parallel>, #tpu.dimension_semantics<arbitrary>], iteration_bounds = array<i64: 1, 2>, scalar_prefetch = 0 : i64, scratch_operands = 1 : i64, tpu.core_type = #tpu.core_type<tc>, window_params = [{transform_indices = @transform_0, window_bounds = array<i64: 16, 32>}, {transform_indices = @transform_1, window_bounds = array<i64: 1, 1, 32>}, {transform_indices = @transform_2, window_bounds = array<i64: 1, 1, 32>}, {transform_indices = @transform_3, window_bounds = array<i64: 1, 32, 96>}, {transform_indices = @transform_4, window_bounds = array<i64: 1, 1, 96>}, {transform_indices = @transform_5, window_bounds = array<i64: 1, 32, 32>}, {transform_indices = @transform_6, window_bounds = array<i64: 1, 1, 32>}, {transform_indices = @transform_7, window_bounds = array<i64: 1, 1, 32>}, {transform_indices = @transform_8, window_bounds = array<i64: 1, 1, 32>}, {transform_indices = @transform_9, window_bounds = array<i64: 1, 32, 128>}, {transform_indices = @transform_10, window_bounds = array<i64: 1, 1, 128>}, {transform_indices = @transform_11, window_bounds = array<i64: 1, 128, 32>}, {transform_indices = @transform_12, window_bounds = array<i64: 1, 1, 32>}, {pipeline_mode = #tpu.pipeline_mode<synchronous>, transform_indices = @transform_13, window_bounds = array<i64: 1, 32>}, {pipeline_mode = #tpu.pipeline_mode<synchronous>, transform_indices = @transform_14, window_bounds = array<i64: 1, 32>}, {pipeline_mode = #tpu.pipeline_mode<synchronous>, transform_indices = @transform_15, window_bounds = array<i64: 32, 128>}, {transform_indices = @transform_16, window_bounds = array<i64: 16, 128>}]} {
    %c0_i32 = arith.constant 0 : i32
    %0 = arith.cmpi eq, %arg1, %c0_i32 : i32
    %1 = arith.extui %0 : i1 to i32
    %c0_i32_0 = arith.constant 0 : i32
    %2 = arith.cmpi ne, %1, %c0_i32_0 : i32
    scf.if %2 {
      %c0_106 = arith.constant 0 : index
      %c0_107 = arith.constant 0 : index
      %297 = vector.load %arg2[%c0_106, %c0_107] : memref<16x32xf32, #tpu.memory_space<vmem>>, vector<16x32xf32>
      %c0_108 = arith.constant 0 : index
      %c0_109 = arith.constant 0 : index
      %298 = vector.load %arg19[%c0_108, %c0_109] : memref<16x32xf32, #tpu.memory_space<vmem>>, vector<16x32xf32>
      tpu.vector_store %arg19[%c0_108, %c0_109], %297 {strides = array<i32>} : memref<16x32xf32, #tpu.memory_space<vmem>>, vector<16x32xf32>,
    } else {
    }
    %c0 = arith.constant 0 : index
    %c0_1 = arith.constant 0 : index
    %3 = vector.load %arg19[%c0, %c0_1] : memref<16x32xf32, #tpu.memory_space<vmem>>, vector<16x32xf32>
    %c0_2 = arith.constant 0 : index
    %c0_3 = arith.constant 0 : index
    %c0_4 = arith.constant 0 : index
    %4 = vector.load %arg3[%c0_2, %c0_3, %c0_4] : memref<1x1x32xf32, #tpu.memory_space<vmem>>, vector<1x1x32xf32>
    %5 = vector.shape_cast %4 : vector<1x1x32xf32> to vector<1x32xf32>
    %c0_5 = arith.constant 0 : index
    %c0_6 = arith.constant 0 : index
    %c0_7 = arith.constant 0 : index
    %6 = vector.load %arg4[%c0_5, %c0_6, %c0_7] : memref<1x1x32xf32, #tpu.memory_space<vmem>>, vector<1x1x32xf32>
    %7 = vector.shape_cast %6 : vector<1x1x32xf32> to vector<1x32xf32>
    %cst = arith.constant dense<0.000000e+00> : vector<16xf32>
    %8 = vector.multi_reduction <add>, %3, %cst [1] : vector<16x32xf32> to vector<16xf32>
    %9 = vector.shape_cast %8 : vector<16xf32> to vector<16x1xf32>
    %cst_8 = arith.constant 3.200000e+01 : f32
    %10 = vector.broadcast %cst_8 : f32 to vector<16x1xf32>
    %11 = arith.divf %9, %10 : vector<16x1xf32>
    %12 = vector.broadcast %11 : vector<16x1xf32> to vector<16x32xf32>
    %13 = arith.subf %3, %12 : vector<16x32xf32>
    %14 = arith.mulf %13, %13 : vector<16x32xf32>
    %cst_9 = arith.constant dense<0.000000e+00> : vector<16xf32>
    %15 = vector.multi_reduction <add>, %14, %cst_9 [1] : vector<16x32xf32> to vector<16xf32>
    %16 = vector.shape_cast %15 : vector<16xf32> to vector<16x1xf32>
    %cst_10 = arith.constant 3.200000e+01 : f32
    %17 = vector.broadcast %cst_10 : f32 to vector<16x1xf32>
    %18 = arith.divf %16, %17 : vector<16x1xf32>
    %19 = vector.broadcast %11 : vector<16x1xf32> to vector<16x32xf32>
    %20 = arith.subf %3, %19 : vector<16x32xf32>
    %cst_11 = arith.constant 9.99999974E-6 : f32
    %21 = vector.broadcast %cst_11 : f32 to vector<16x1xf32>
    %22 = arith.addf %18, %21 : vector<16x1xf32>
    %23 = math.rsqrt %22 : vector<16x1xf32>
    %24 = vector.broadcast %23 : vector<16x1xf32> to vector<16x32xf32>
    %25 = arith.mulf %20, %24 : vector<16x32xf32>
    %26 = vector.broadcast %5 : vector<1x32xf32> to vector<16x32xf32>
    %27 = arith.mulf %25, %26 : vector<16x32xf32>
    %28 = vector.broadcast %7 : vector<1x32xf32> to vector<16x32xf32>
    %29 = arith.addf %27, %28 : vector<16x32xf32>
    %30 = arith.truncf %29 : vector<16x32xf32> to vector<16x32xbf16>
    %c0_12 = arith.constant 0 : index
    %c0_13 = arith.constant 0 : index
    %c0_14 = arith.constant 0 : index
    %31 = vector.load %arg5[%c0_12, %c0_13, %c0_14] : memref<1x32x96xbf16, #tpu.memory_space<vmem>>, vector<1x32x96xbf16>
    %32 = vector.shape_cast %31 : vector<1x32x96xbf16> to vector<32x96xbf16>
    %cst_15 = arith.constant dense<0.000000e+00> : vector<16x96xf32>
    %33 = tpu.matmul %30, %32, %cst_15 {dimension_numbers = #tpu.dot_dimension_numbers<[1], [0], [0], [1], [0, 0, 1, 1], [], []>} : vector<16x32xbf16>, vector<32x96xbf16>, vector<16x96xf32> -> vector<16x96xf32>
    %c0_16 = arith.constant 0 : index
    %c0_17 = arith.constant 0 : index
    %c0_18 = arith.constant 0 : index
    %34 = vector.load %arg6[%c0_16, %c0_17, %c0_18] : memref<1x1x96xf32, #tpu.memory_space<vmem>>, vector<1x1x96xf32>
    %35 = vector.shape_cast %34 : vector<1x1x96xf32> to vector<1x96xf32>
    %36 = vector.broadcast %35 : vector<1x96xf32> to vector<16x96xf32>
    %37 = arith.addf %33, %36 : vector<16x96xf32>
    %38 = tpu.iota {dimensions = array<i32: 0>} : vector<8x8xi32>
    %39 = tpu.iota {dimensions = array<i32: 1>} : vector<8x8xi32>
    %40 = arith.cmpi sle, %39, %38 : vector<8x8xi32>
    %41 = vector.extract_strided_slice %37 {offsets = [0, 0], sizes = [8, 8], strides = [1, 1]} : vector<16x96xf32> to vector<8x8xf32>
    %42 = arith.truncf %41 : vector<8x8xf32> to vector<8x8xbf16>
    %43 = vector.extract_strided_slice %37 {offsets = [0, 32], sizes = [8, 8], strides = [1, 1]} : vector<16x96xf32> to vector<8x8xf32>
    %44 = arith.truncf %43 : vector<8x8xf32> to vector<8x8xbf16>
    %45 = vector.extract_strided_slice %37 {offsets = [0, 64], sizes = [8, 8], strides = [1, 1]} : vector<16x96xf32> to vector<8x8xf32>
    %46 = arith.truncf %45 : vector<8x8xf32> to vector<8x8xbf16>
    %cst_19 = arith.constant dense<0.000000e+00> : vector<8x8xf32>
    %47 = tpu.matmul %42, %44, %cst_19 {dimension_numbers = #tpu.dot_dimension_numbers<[1], [1], [0], [0], [0, 0, 1, 0], [], []>} : vector<8x8xbf16>, vector<8x8xbf16>, vector<8x8xf32> -> vector<8x8xf32>
    %cst_20 = arith.constant 0.353553385 : f32
    %48 = vector.broadcast %cst_20 : f32 to vector<8x8xf32>
    %49 = arith.mulf %47, %48 : vector<8x8xf32>
    %cst_21 = arith.constant -1.000000e+30 : f32
    %50 = vector.broadcast %cst_21 : f32 to vector<8x8xf32>
    %51 = arith.select %40, %49, %50 : vector<8x8xi1>, vector<8x8xf32>
    %cst_22 = arith.constant dense<0xFF800000> : vector<8xf32>
    %52 = vector.multi_reduction <maximumf>, %51, %cst_22 [1] : vector<8x8xf32> to vector<8xf32>
    %53 = vector.shape_cast %52 : vector<8xf32> to vector<8x1xf32>
    %54 = vector.broadcast %53 : vector<8x1xf32> to vector<8x8xf32>
    %55 = arith.subf %51, %54 : vector<8x8xf32>
    %56 = math.exp %55 : vector<8x8xf32>
    %cst_23 = arith.constant dense<0.000000e+00> : vector<8xf32>
    %57 = vector.multi_reduction <add>, %56, %cst_23 [1] : vector<8x8xf32> to vector<8xf32>
    %58 = vector.shape_cast %57 : vector<8xf32> to vector<8x1xf32>
    %59 = tpu.reciprocal %58 {approx = true} : vector<8x1xf32> -> vector<8x1xf32>
    %60 = vector.broadcast %59 : vector<8x1xf32> to vector<8x8xf32>
    %61 = arith.mulf %56, %60 : vector<8x8xf32>
    %62 = arith.truncf %61 : vector<8x8xf32> to vector<8x8xbf16>
    %cst_24 = arith.constant dense<0.000000e+00> : vector<8x8xf32>
    %63 = tpu.matmul %62, %46, %cst_24 {dimension_numbers = #tpu.dot_dimension_numbers<[1], [0], [0], [1], [0, 0, 1, 1], [], []>} : vector<8x8xbf16>, vector<8x8xbf16>, vector<8x8xf32> -> vector<8x8xf32>
    %64 = vector.extract_strided_slice %37 {offsets = [0, 8], sizes = [8, 8], strides = [1, 1]} : vector<16x96xf32> to vector<8x8xf32>
    %65 = arith.truncf %64 : vector<8x8xf32> to vector<8x8xbf16>
    %66 = vector.extract_strided_slice %37 {offsets = [0, 40], sizes = [8, 8], strides = [1, 1]} : vector<16x96xf32> to vector<8x8xf32>
    %67 = arith.truncf %66 : vector<8x8xf32> to vector<8x8xbf16>
    %68 = vector.extract_strided_slice %37 {offsets = [0, 72], sizes = [8, 8], strides = [1, 1]} : vector<16x96xf32> to vector<8x8xf32>
    %69 = arith.truncf %68 : vector<8x8xf32> to vector<8x8xbf16>
    %cst_25 = arith.constant dense<0.000000e+00> : vector<8x8xf32>
    %70 = tpu.matmul %65, %67, %cst_25 {dimension_numbers = #tpu.dot_dimension_numbers<[1], [1], [0], [0], [0, 0, 1, 0], [], []>} : vector<8x8xbf16>, vector<8x8xbf16>, vector<8x8xf32> -> vector<8x8xf32>
    %cst_26 = arith.constant 0.353553385 : f32
    %71 = vector.broadcast %cst_26 : f32 to vector<8x8xf32>
    %72 = arith.mulf %70, %71 : vector<8x8xf32>
    %cst_27 = arith.constant -1.000000e+30 : f32
    %73 = vector.broadcast %cst_27 : f32 to vector<8x8xf32>
    %74 = arith.select %40, %72, %73 : vector<8x8xi1>, vector<8x8xf32>
    %cst_28 = arith.constant dense<0xFF800000> : vector<8xf32>
    %75 = vector.multi_reduction <maximumf>, %74, %cst_28 [1] : vector<8x8xf32> to vector<8xf32>
    %76 = vector.shape_cast %75 : vector<8xf32> to vector<8x1xf32>
    %77 = vector.broadcast %76 : vector<8x1xf32> to vector<8x8xf32>
    %78 = arith.subf %74, %77 : vector<8x8xf32>
    %79 = math.exp %78 : vector<8x8xf32>
    %cst_29 = arith.constant dense<0.000000e+00> : vector<8xf32>
    %80 = vector.multi_reduction <add>, %79, %cst_29 [1] : vector<8x8xf32> to vector<8xf32>
    %81 = vector.shape_cast %80 : vector<8xf32> to vector<8x1xf32>
    %82 = tpu.reciprocal %81 {approx = true} : vector<8x1xf32> -> vector<8x1xf32>
    %83 = vector.broadcast %82 : vector<8x1xf32> to vector<8x8xf32>
    %84 = arith.mulf %79, %83 : vector<8x8xf32>
    %85 = arith.truncf %84 : vector<8x8xf32> to vector<8x8xbf16>
    %cst_30 = arith.constant dense<0.000000e+00> : vector<8x8xf32>
    %86 = tpu.matmul %85, %69, %cst_30 {dimension_numbers = #tpu.dot_dimension_numbers<[1], [0], [0], [1], [0, 0, 1, 1], [], []>} : vector<8x8xbf16>, vector<8x8xbf16>, vector<8x8xf32> -> vector<8x8xf32>
    %87 = vector.extract_strided_slice %37 {offsets = [0, 16], sizes = [8, 8], strides = [1, 1]} : vector<16x96xf32> to vector<8x8xf32>
    %88 = arith.truncf %87 : vector<8x8xf32> to vector<8x8xbf16>
    %89 = vector.extract_strided_slice %37 {offsets = [0, 48], sizes = [8, 8], strides = [1, 1]} : vector<16x96xf32> to vector<8x8xf32>
    %90 = arith.truncf %89 : vector<8x8xf32> to vector<8x8xbf16>
    %91 = vector.extract_strided_slice %37 {offsets = [0, 80], sizes = [8, 8], strides = [1, 1]} : vector<16x96xf32> to vector<8x8xf32>
    %92 = arith.truncf %91 : vector<8x8xf32> to vector<8x8xbf16>
    %cst_31 = arith.constant dense<0.000000e+00> : vector<8x8xf32>
    %93 = tpu.matmul %88, %90, %cst_31 {dimension_numbers = #tpu.dot_dimension_numbers<[1], [1], [0], [0], [0, 0, 1, 0], [], []>} : vector<8x8xbf16>, vector<8x8xbf16>, vector<8x8xf32> -> vector<8x8xf32>
    %cst_32 = arith.constant 0.353553385 : f32
    %94 = vector.broadcast %cst_32 : f32 to vector<8x8xf32>
    %95 = arith.mulf %93, %94 : vector<8x8xf32>
    %cst_33 = arith.constant -1.000000e+30 : f32
    %96 = vector.broadcast %cst_33 : f32 to vector<8x8xf32>
    %97 = arith.select %40, %95, %96 : vector<8x8xi1>, vector<8x8xf32>
    %cst_34 = arith.constant dense<0xFF800000> : vector<8xf32>
    %98 = vector.multi_reduction <maximumf>, %97, %cst_34 [1] : vector<8x8xf32> to vector<8xf32>
    %99 = vector.shape_cast %98 : vector<8xf32> to vector<8x1xf32>
    %100 = vector.broadcast %99 : vector<8x1xf32> to vector<8x8xf32>
    %101 = arith.subf %97, %100 : vector<8x8xf32>
    %102 = math.exp %101 : vector<8x8xf32>
    %cst_35 = arith.constant dense<0.000000e+00> : vector<8xf32>
    %103 = vector.multi_reduction <add>, %102, %cst_35 [1] : vector<8x8xf32> to vector<8xf32>
    %104 = vector.shape_cast %103 : vector<8xf32> to vector<8x1xf32>
    %105 = tpu.reciprocal %104 {approx = true} : vector<8x1xf32> -> vector<8x1xf32>
    %106 = vector.broadcast %105 : vector<8x1xf32> to vector<8x8xf32>
    %107 = arith.mulf %102, %106 : vector<8x8xf32>
    %108 = arith.truncf %107 : vector<8x8xf32> to vector<8x8xbf16>
    %cst_36 = arith.constant dense<0.000000e+00> : vector<8x8xf32>
    %109 = tpu.matmul %108, %92, %cst_36 {dimension_numbers = #tpu.dot_dimension_numbers<[1], [0], [0], [1], [0, 0, 1, 1], [], []>} : vector<8x8xbf16>, vector<8x8xbf16>, vector<8x8xf32> -> vector<8x8xf32>
    %110 = vector.extract_strided_slice %37 {offsets = [0, 24], sizes = [8, 8], strides = [1, 1]} : vector<16x96xf32> to vector<8x8xf32>
    %111 = arith.truncf %110 : vector<8x8xf32> to vector<8x8xbf16>
    %112 = vector.extract_strided_slice %37 {offsets = [0, 56], sizes = [8, 8], strides = [1, 1]} : vector<16x96xf32> to vector<8x8xf32>
    %113 = arith.truncf %112 : vector<8x8xf32> to vector<8x8xbf16>
    %114 = vector.extract_strided_slice %37 {offsets = [0, 88], sizes = [8, 8], strides = [1, 1]} : vector<16x96xf32> to vector<8x8xf32>
    %115 = arith.truncf %114 : vector<8x8xf32> to vector<8x8xbf16>
    %cst_37 = arith.constant dense<0.000000e+00> : vector<8x8xf32>
    %116 = tpu.matmul %111, %113, %cst_37 {dimension_numbers = #tpu.dot_dimension_numbers<[1], [1], [0], [0], [0, 0, 1, 0], [], []>} : vector<8x8xbf16>, vector<8x8xbf16>, vector<8x8xf32> -> vector<8x8xf32>
    %cst_38 = arith.constant 0.353553385 : f32
    %117 = vector.broadcast %cst_38 : f32 to vector<8x8xf32>
    %118 = arith.mulf %116, %117 : vector<8x8xf32>
    %cst_39 = arith.constant -1.000000e+30 : f32
    %119 = vector.broadcast %cst_39 : f32 to vector<8x8xf32>
    %120 = arith.select %40, %118, %119 : vector<8x8xi1>, vector<8x8xf32>
    %cst_40 = arith.constant dense<0xFF800000> : vector<8xf32>
    %121 = vector.multi_reduction <maximumf>, %120, %cst_40 [1] : vector<8x8xf32> to vector<8xf32>
    %122 = vector.shape_cast %121 : vector<8xf32> to vector<8x1xf32>
    %123 = vector.broadcast %122 : vector<8x1xf32> to vector<8x8xf32>
    %124 = arith.subf %120, %123 : vector<8x8xf32>
    %125 = math.exp %124 : vector<8x8xf32>
    %cst_41 = arith.constant dense<0.000000e+00> : vector<8xf32>
    %126 = vector.multi_reduction <add>, %125, %cst_41 [1] : vector<8x8xf32> to vector<8xf32>
    %127 = vector.shape_cast %126 : vector<8xf32> to vector<8x1xf32>
    %128 = tpu.reciprocal %127 {approx = true} : vector<8x1xf32> -> vector<8x1xf32>
    %129 = vector.broadcast %128 : vector<8x1xf32> to vector<8x8xf32>
    %130 = arith.mulf %125, %129 : vector<8x8xf32>
    %131 = arith.truncf %130 : vector<8x8xf32> to vector<8x8xbf16>
    %cst_42 = arith.constant dense<0.000000e+00> : vector<8x8xf32>
    %132 = tpu.matmul %131, %115, %cst_42 {dimension_numbers = #tpu.dot_dimension_numbers<[1], [0], [0], [1], [0, 0, 1, 1], [], []>} : vector<8x8xbf16>, vector<8x8xbf16>, vector<8x8xf32> -> vector<8x8xf32>
    %133 = tpu.concatenate %63, %86, %109, %132 in 1 : vector<8x8xf32>, vector<8x8xf32>, vector<8x8xf32>, vector<8x8xf32> -> vector<8x32xf32>
    %134 = vector.extract_strided_slice %37 {offsets = [8, 0], sizes = [8, 8], strides = [1, 1]} : vector<16x96xf32> to vector<8x8xf32>
    %135 = arith.truncf %134 : vector<8x8xf32> to vector<8x8xbf16>
    %136 = vector.extract_strided_slice %37 {offsets = [8, 32], sizes = [8, 8], strides = [1, 1]} : vector<16x96xf32> to vector<8x8xf32>
    %137 = arith.truncf %136 : vector<8x8xf32> to vector<8x8xbf16>
    %138 = vector.extract_strided_slice %37 {offsets = [8, 64], sizes = [8, 8], strides = [1, 1]} : vector<16x96xf32> to vector<8x8xf32>
    %139 = arith.truncf %138 : vector<8x8xf32> to vector<8x8xbf16>
    %cst_43 = arith.constant dense<0.000000e+00> : vector<8x8xf32>
    %140 = tpu.matmul %135, %137, %cst_43 {dimension_numbers = #tpu.dot_dimension_numbers<[1], [1], [0], [0], [0, 0, 1, 0], [], []>} : vector<8x8xbf16>, vector<8x8xbf16>, vector<8x8xf32> -> vector<8x8xf32>
    %cst_44 = arith.constant 0.353553385 : f32
    %141 = vector.broadcast %cst_44 : f32 to vector<8x8xf32>
    %142 = arith.mulf %140, %141 : vector<8x8xf32>
    %cst_45 = arith.constant -1.000000e+30 : f32
    %143 = vector.broadcast %cst_45 : f32 to vector<8x8xf32>
    %144 = arith.select %40, %142, %143 : vector<8x8xi1>, vector<8x8xf32>
    %cst_46 = arith.constant dense<0xFF800000> : vector<8xf32>
    %145 = vector.multi_reduction <maximumf>, %144, %cst_46 [1] : vector<8x8xf32> to vector<8xf32>
    %146 = vector.shape_cast %145 : vector<8xf32> to vector<8x1xf32>
    %147 = vector.broadcast %146 : vector<8x1xf32> to vector<8x8xf32>
    %148 = arith.subf %144, %147 : vector<8x8xf32>
    %149 = math.exp %148 : vector<8x8xf32>
    %cst_47 = arith.constant dense<0.000000e+00> : vector<8xf32>
    %150 = vector.multi_reduction <add>, %149, %cst_47 [1] : vector<8x8xf32> to vector<8xf32>
    %151 = vector.shape_cast %150 : vector<8xf32> to vector<8x1xf32>
    %152 = tpu.reciprocal %151 {approx = true} : vector<8x1xf32> -> vector<8x1xf32>
    %153 = vector.broadcast %152 : vector<8x1xf32> to vector<8x8xf32>
    %154 = arith.mulf %149, %153 : vector<8x8xf32>
    %155 = arith.truncf %154 : vector<8x8xf32> to vector<8x8xbf16>
    %cst_48 = arith.constant dense<0.000000e+00> : vector<8x8xf32>
    %156 = tpu.matmul %155, %139, %cst_48 {dimension_numbers = #tpu.dot_dimension_numbers<[1], [0], [0], [1], [0, 0, 1, 1], [], []>} : vector<8x8xbf16>, vector<8x8xbf16>, vector<8x8xf32> -> vector<8x8xf32>
    %157 = vector.extract_strided_slice %37 {offsets = [8, 8], sizes = [8, 8], strides = [1, 1]} : vector<16x96xf32> to vector<8x8xf32>
    %158 = arith.truncf %157 : vector<8x8xf32> to vector<8x8xbf16>
    %159 = vector.extract_strided_slice %37 {offsets = [8, 40], sizes = [8, 8], strides = [1, 1]} : vector<16x96xf32> to vector<8x8xf32>
    %160 = arith.truncf %159 : vector<8x8xf32> to vector<8x8xbf16>
    %161 = vector.extract_strided_slice %37 {offsets = [8, 72], sizes = [8, 8], strides = [1, 1]} : vector<16x96xf32> to vector<8x8xf32>
    %162 = arith.truncf %161 : vector<8x8xf32> to vector<8x8xbf16>
    %cst_49 = arith.constant dense<0.000000e+00> : vector<8x8xf32>
    %163 = tpu.matmul %158, %160, %cst_49 {dimension_numbers = #tpu.dot_dimension_numbers<[1], [1], [0], [0], [0, 0, 1, 0], [], []>} : vector<8x8xbf16>, vector<8x8xbf16>, vector<8x8xf32> -> vector<8x8xf32>
    %cst_50 = arith.constant 0.353553385 : f32
    %164 = vector.broadcast %cst_50 : f32 to vector<8x8xf32>
    %165 = arith.mulf %163, %164 : vector<8x8xf32>
    %cst_51 = arith.constant -1.000000e+30 : f32
    %166 = vector.broadcast %cst_51 : f32 to vector<8x8xf32>
    %167 = arith.select %40, %165, %166 : vector<8x8xi1>, vector<8x8xf32>
    %cst_52 = arith.constant dense<0xFF800000> : vector<8xf32>
    %168 = vector.multi_reduction <maximumf>, %167, %cst_52 [1] : vector<8x8xf32> to vector<8xf32>
    %169 = vector.shape_cast %168 : vector<8xf32> to vector<8x1xf32>
    %170 = vector.broadcast %169 : vector<8x1xf32> to vector<8x8xf32>
    %171 = arith.subf %167, %170 : vector<8x8xf32>
    %172 = math.exp %171 : vector<8x8xf32>
    %cst_53 = arith.constant dense<0.000000e+00> : vector<8xf32>
    %173 = vector.multi_reduction <add>, %172, %cst_53 [1] : vector<8x8xf32> to vector<8xf32>
    %174 = vector.shape_cast %173 : vector<8xf32> to vector<8x1xf32>
    %175 = tpu.reciprocal %174 {approx = true} : vector<8x1xf32> -> vector<8x1xf32>
    %176 = vector.broadcast %175 : vector<8x1xf32> to vector<8x8xf32>
    %177 = arith.mulf %172, %176 : vector<8x8xf32>
    %178 = arith.truncf %177 : vector<8x8xf32> to vector<8x8xbf16>
    %cst_54 = arith.constant dense<0.000000e+00> : vector<8x8xf32>
    %179 = tpu.matmul %178, %162, %cst_54 {dimension_numbers = #tpu.dot_dimension_numbers<[1], [0], [0], [1], [0, 0, 1, 1], [], []>} : vector<8x8xbf16>, vector<8x8xbf16>, vector<8x8xf32> -> vector<8x8xf32>
    %180 = vector.extract_strided_slice %37 {offsets = [8, 16], sizes = [8, 8], strides = [1, 1]} : vector<16x96xf32> to vector<8x8xf32>
    %181 = arith.truncf %180 : vector<8x8xf32> to vector<8x8xbf16>
    %182 = vector.extract_strided_slice %37 {offsets = [8, 48], sizes = [8, 8], strides = [1, 1]} : vector<16x96xf32> to vector<8x8xf32>
    %183 = arith.truncf %182 : vector<8x8xf32> to vector<8x8xbf16>
    %184 = vector.extract_strided_slice %37 {offsets = [8, 80], sizes = [8, 8], strides = [1, 1]} : vector<16x96xf32> to vector<8x8xf32>
    %185 = arith.truncf %184 : vector<8x8xf32> to vector<8x8xbf16>
    %cst_55 = arith.constant dense<0.000000e+00> : vector<8x8xf32>
    %186 = tpu.matmul %181, %183, %cst_55 {dimension_numbers = #tpu.dot_dimension_numbers<[1], [1], [0], [0], [0, 0, 1, 0], [], []>} : vector<8x8xbf16>, vector<8x8xbf16>, vector<8x8xf32> -> vector<8x8xf32>
    %cst_56 = arith.constant 0.353553385 : f32
    %187 = vector.broadcast %cst_56 : f32 to vector<8x8xf32>
    %188 = arith.mulf %186, %187 : vector<8x8xf32>
    %cst_57 = arith.constant -1.000000e+30 : f32
    %189 = vector.broadcast %cst_57 : f32 to vector<8x8xf32>
    %190 = arith.select %40, %188, %189 : vector<8x8xi1>, vector<8x8xf32>
    %cst_58 = arith.constant dense<0xFF800000> : vector<8xf32>
    %191 = vector.multi_reduction <maximumf>, %190, %cst_58 [1] : vector<8x8xf32> to vector<8xf32>
    %192 = vector.shape_cast %191 : vector<8xf32> to vector<8x1xf32>
    %193 = vector.broadcast %192 : vector<8x1xf32> to vector<8x8xf32>
    %194 = arith.subf %190, %193 : vector<8x8xf32>
    %195 = math.exp %194 : vector<8x8xf32>
    %cst_59 = arith.constant dense<0.000000e+00> : vector<8xf32>
    %196 = vector.multi_reduction <add>, %195, %cst_59 [1] : vector<8x8xf32> to vector<8xf32>
    %197 = vector.shape_cast %196 : vector<8xf32> to vector<8x1xf32>
    %198 = tpu.reciprocal %197 {approx = true} : vector<8x1xf32> -> vector<8x1xf32>
    %199 = vector.broadcast %198 : vector<8x1xf32> to vector<8x8xf32>
    %200 = arith.mulf %195, %199 : vector<8x8xf32>
    %201 = arith.truncf %200 : vector<8x8xf32> to vector<8x8xbf16>
    %cst_60 = arith.constant dense<0.000000e+00> : vector<8x8xf32>
    %202 = tpu.matmul %201, %185, %cst_60 {dimension_numbers = #tpu.dot_dimension_numbers<[1], [0], [0], [1], [0, 0, 1, 1], [], []>} : vector<8x8xbf16>, vector<8x8xbf16>, vector<8x8xf32> -> vector<8x8xf32>
    %203 = vector.extract_strided_slice %37 {offsets = [8, 24], sizes = [8, 8], strides = [1, 1]} : vector<16x96xf32> to vector<8x8xf32>
    %204 = arith.truncf %203 : vector<8x8xf32> to vector<8x8xbf16>
    %205 = vector.extract_strided_slice %37 {offsets = [8, 56], sizes = [8, 8], strides = [1, 1]} : vector<16x96xf32> to vector<8x8xf32>
    %206 = arith.truncf %205 : vector<8x8xf32> to vector<8x8xbf16>
    %207 = vector.extract_strided_slice %37 {offsets = [8, 88], sizes = [8, 8], strides = [1, 1]} : vector<16x96xf32> to vector<8x8xf32>
    %208 = arith.truncf %207 : vector<8x8xf32> to vector<8x8xbf16>
    %cst_61 = arith.constant dense<0.000000e+00> : vector<8x8xf32>
    %209 = tpu.matmul %204, %206, %cst_61 {dimension_numbers = #tpu.dot_dimension_numbers<[1], [1], [0], [0], [0, 0, 1, 0], [], []>} : vector<8x8xbf16>, vector<8x8xbf16>, vector<8x8xf32> -> vector<8x8xf32>
    %cst_62 = arith.constant 0.353553385 : f32
    %210 = vector.broadcast %cst_62 : f32 to vector<8x8xf32>
    %211 = arith.mulf %209, %210 : vector<8x8xf32>
    %cst_63 = arith.constant -1.000000e+30 : f32
    %212 = vector.broadcast %cst_63 : f32 to vector<8x8xf32>
    %213 = arith.select %40, %211, %212 : vector<8x8xi1>, vector<8x8xf32>
    %cst_64 = arith.constant dense<0xFF800000> : vector<8xf32>
    %214 = vector.multi_reduction <maximumf>, %213, %cst_64 [1] : vector<8x8xf32> to vector<8xf32>
    %215 = vector.shape_cast %214 : vector<8xf32> to vector<8x1xf32>
    %216 = vector.broadcast %215 : vector<8x1xf32> to vector<8x8xf32>
    %217 = arith.subf %213, %216 : vector<8x8xf32>
    %218 = math.exp %217 : vector<8x8xf32>
    %cst_65 = arith.constant dense<0.000000e+00> : vector<8xf32>
    %219 = vector.multi_reduction <add>, %218, %cst_65 [1] : vector<8x8xf32> to vector<8xf32>
    %220 = vector.shape_cast %219 : vector<8xf32> to vector<8x1xf32>
    %221 = tpu.reciprocal %220 {approx = true} : vector<8x1xf32> -> vector<8x1xf32>
    %222 = vector.broadcast %221 : vector<8x1xf32> to vector<8x8xf32>
    %223 = arith.mulf %218, %222 : vector<8x8xf32>
    %224 = arith.truncf %223 : vector<8x8xf32> to vector<8x8xbf16>
    %cst_66 = arith.constant dense<0.000000e+00> : vector<8x8xf32>
    %225 = tpu.matmul %224, %208, %cst_66 {dimension_numbers = #tpu.dot_dimension_numbers<[1], [0], [0], [1], [0, 0, 1, 1], [], []>} : vector<8x8xbf16>, vector<8x8xbf16>, vector<8x8xf32> -> vector<8x8xf32>
    %226 = tpu.concatenate %156, %179, %202, %225 in 1 : vector<8x8xf32>, vector<8x8xf32>, vector<8x8xf32>, vector<8x8xf32> -> vector<8x32xf32>
    %227 = tpu.concatenate %133, %226 in 0 : vector<8x32xf32>, vector<8x32xf32> -> vector<16x32xf32>
    %228 = arith.truncf %227 : vector<16x32xf32> to vector<16x32xbf16>
    %c0_67 = arith.constant 0 : index
    %c0_68 = arith.constant 0 : index
    %c0_69 = arith.constant 0 : index
    %229 = vector.load %arg7[%c0_67, %c0_68, %c0_69] : memref<1x32x32xbf16, #tpu.memory_space<vmem>>, vector<1x32x32xbf16>
    %230 = vector.shape_cast %229 : vector<1x32x32xbf16> to vector<32x32xbf16>
    %cst_70 = arith.constant dense<0.000000e+00> : vector<16x32xf32>
    %231 = tpu.matmul %228, %230, %cst_70 {dimension_numbers = #tpu.dot_dimension_numbers<[1], [0], [0], [1], [0, 0, 1, 1], [], []>} : vector<16x32xbf16>, vector<32x32xbf16>, vector<16x32xf32> -> vector<16x32xf32>
    %c0_71 = arith.constant 0 : index
    %c0_72 = arith.constant 0 : index
    %c0_73 = arith.constant 0 : index
    %232 = vector.load %arg8[%c0_71, %c0_72, %c0_73] : memref<1x1x32xf32, #tpu.memory_space<vmem>>, vector<1x1x32xf32>
    %233 = vector.shape_cast %232 : vector<1x1x32xf32> to vector<1x32xf32>
    %234 = vector.broadcast %233 : vector<1x32xf32> to vector<16x32xf32>
    %235 = arith.addf %231, %234 : vector<16x32xf32>
    %236 = arith.addf %3, %235 : vector<16x32xf32>
    %c0_74 = arith.constant 0 : index
    %c0_75 = arith.constant 0 : index
    %c0_76 = arith.constant 0 : index
    %237 = vector.load %arg9[%c0_74, %c0_75, %c0_76] : memref<1x1x32xf32, #tpu.memory_space<vmem>>, vector<1x1x32xf32>
    %238 = vector.shape_cast %237 : vector<1x1x32xf32> to vector<1x32xf32>
    %c0_77 = arith.constant 0 : index
    %c0_78 = arith.constant 0 : index
    %c0_79 = arith.constant 0 : index
    %239 = vector.load %arg10[%c0_77, %c0_78, %c0_79] : memref<1x1x32xf32, #tpu.memory_space<vmem>>, vector<1x1x32xf32>
    %240 = vector.shape_cast %239 : vector<1x1x32xf32> to vector<1x32xf32>
    %cst_80 = arith.constant dense<0.000000e+00> : vector<16xf32>
    %241 = vector.multi_reduction <add>, %236, %cst_80 [1] : vector<16x32xf32> to vector<16xf32>
    %242 = vector.shape_cast %241 : vector<16xf32> to vector<16x1xf32>
    %cst_81 = arith.constant 3.200000e+01 : f32
    %243 = vector.broadcast %cst_81 : f32 to vector<16x1xf32>
    %244 = arith.divf %242, %243 : vector<16x1xf32>
    %245 = vector.broadcast %244 : vector<16x1xf32> to vector<16x32xf32>
    %246 = arith.subf %236, %245 : vector<16x32xf32>
    %247 = arith.mulf %246, %246 : vector<16x32xf32>
    %cst_82 = arith.constant dense<0.000000e+00> : vector<16xf32>
    %248 = vector.multi_reduction <add>, %247, %cst_82 [1] : vector<16x32xf32> to vector<16xf32>
    %249 = vector.shape_cast %248 : vector<16xf32> to vector<16x1xf32>
    %cst_83 = arith.constant 3.200000e+01 : f32
    %250 = vector.broadcast %cst_83 : f32 to vector<16x1xf32>
    %251 = arith.divf %249, %250 : vector<16x1xf32>
    %252 = vector.broadcast %244 : vector<16x1xf32> to vector<16x32xf32>
    %253 = arith.subf %236, %252 : vector<16x32xf32>
    %cst_84 = arith.constant 9.99999974E-6 : f32
    %254 = vector.broadcast %cst_84 : f32 to vector<16x1xf32>
    %255 = arith.addf %251, %254 : vector<16x1xf32>
    %256 = math.rsqrt %255 : vector<16x1xf32>
    %257 = vector.broadcast %256 : vector<16x1xf32> to vector<16x32xf32>
    %258 = arith.mulf %253, %257 : vector<16x32xf32>
    %259 = vector.broadcast %238 : vector<1x32xf32> to vector<16x32xf32>
    %260 = arith.mulf %258, %259 : vector<16x32xf32>
    %261 = vector.broadcast %240 : vector<1x32xf32> to vector<16x32xf32>
    %262 = arith.addf %260, %261 : vector<16x32xf32>
    %263 = arith.truncf %262 : vector<16x32xf32> to vector<16x32xbf16>
    %c0_85 = arith.constant 0 : index
    %c0_86 = arith.constant 0 : index
    %c0_87 = arith.constant 0 : index
    %264 = vector.load %arg11[%c0_85, %c0_86, %c0_87] : memref<1x32x128xbf16, #tpu.memory_space<vmem>>, vector<1x32x128xbf16>
    %265 = vector.shape_cast %264 : vector<1x32x128xbf16> to vector<32x128xbf16>
    %cst_88 = arith.constant dense<0.000000e+00> : vector<16x128xf32>
    %266 = tpu.matmul %263, %265, %cst_88 {dimension_numbers = #tpu.dot_dimension_numbers<[1], [0], [0], [1], [0, 0, 1, 1], [], []>} : vector<16x32xbf16>, vector<32x128xbf16>, vector<16x128xf32> -> vector<16x128xf32>
    %c0_89 = arith.constant 0 : index
    %c0_90 = arith.constant 0 : index
    %c0_91 = arith.constant 0 : index
    %267 = vector.load %arg12[%c0_89, %c0_90, %c0_91] : memref<1x1x128xf32, #tpu.memory_space<vmem>>, vector<1x1x128xf32>
    %268 = vector.shape_cast %267 : vector<1x1x128xf32> to vector<1x128xf32>
    %269 = vector.broadcast %268 : vector<1x128xf32> to vector<16x128xf32>
    %270 = arith.addf %266, %269 : vector<16x128xf32>
    %cst_92 = arith.constant 5.000000e-01 : f32
    %271 = vector.broadcast %cst_92 : f32 to vector<16x128xf32>
    %272 = arith.mulf %271, %270 : vector<16x128xf32>
    %273 = arith.mulf %270, %270 : vector<16x128xf32>
    %274 = arith.mulf %273, %270 : vector<16x128xf32>
    %cst_93 = arith.constant 4.471500e-02 : f32
    %275 = vector.broadcast %cst_93 : f32 to vector<16x128xf32>
    %276 = arith.mulf %275, %274 : vector<16x128xf32>
    %277 = arith.addf %270, %276 : vector<16x128xf32>
    %cst_94 = arith.constant 0.797884583 : f32
    %278 = vector.broadcast %cst_94 : f32 to vector<16x128xf32>
    %279 = arith.mulf %278, %277 : vector<16x128xf32>
    %280 = math.tanh %279 : vector<16x128xf32>
    %cst_95 = arith.constant 1.000000e+00 : f32
    %281 = vector.broadcast %cst_95 : f32 to vector<16x128xf32>
    %282 = arith.addf %281, %280 : vector<16x128xf32>
    %283 = arith.mulf %272, %282 : vector<16x128xf32>
    %284 = arith.truncf %283 : vector<16x128xf32> to vector<16x128xbf16>
    %c0_96 = arith.constant 0 : index
    %c0_97 = arith.constant 0 : index
    %c0_98 = arith.constant 0 : index
    %285 = vector.load %arg13[%c0_96, %c0_97, %c0_98] : memref<1x128x32xbf16, #tpu.memory_space<vmem>>, vector<1x128x32xbf16>
    %286 = vector.shape_cast %285 : vector<1x128x32xbf16> to vector<128x32xbf16>
    %cst_99 = arith.constant dense<0.000000e+00> : vector<16x32xf32>
    %287 = tpu.matmul %284, %286, %cst_99 {dimension_numbers = #tpu.dot_dimension_numbers<[1], [0], [0], [1], [0, 0, 1, 1], [], []>} : vector<16x128xbf16>, vector<128x32xbf16>, vector<16x32xf32> -> vector<16x32xf32>
    %c0_100 = arith.constant 0 : index
    %c0_101 = arith.constant 0 : index
    %c0_102 = arith.constant 0 : index
    %288 = vector.load %arg14[%c0_100, %c0_101, %c0_102] : memref<1x1x32xf32, #tpu.memory_space<vmem>>, vector<1x1x32xf32>
    %289 = vector.shape_cast %288 : vector<1x1x32xf32> to vector<1x32xf32>
    %290 = vector.broadcast %289 : vector<1x32xf32> to vector<16x32xf32>
    %291 = arith.addf %287, %290 : vector<16x32xf32>
    %292 = arith.addf %236, %291 : vector<16x32xf32>
    %c0_103 = arith.constant 0 : index
    %c0_104 = arith.constant 0 : index
    %293 = vector.load %arg19[%c0_103, %c0_104] : memref<16x32xf32, #tpu.memory_space<vmem>>, vector<16x32xf32>
    tpu.vector_store %arg19[%c0_103, %c0_104], %292 {strides = array<i32>} : memref<16x32xf32, #tpu.memory_space<vmem>>, vector<16x32xf32>,
    %c1_i32 = arith.constant 1 : i32
    %294 = arith.cmpi eq, %arg1, %c1_i32 : i32
    %295 = arith.extui %294 : i1 to i32
    %c0_i32_105 = arith.constant 0 : i32
    %296 = arith.cmpi ne, %295, %c0_i32_105 : i32
    scf.if %296 {
      %c0_106 = arith.constant 0 : index
      %c0_107 = arith.constant 0 : index
      %297 = vector.load %arg15[%c0_106, %c0_107] : memref<1x32xf32, #tpu.memory_space<vmem>>, vector<1x32xf32>
      %c0_108 = arith.constant 0 : index
      %c0_109 = arith.constant 0 : index
      %298 = vector.load %arg16[%c0_108, %c0_109] : memref<1x32xf32, #tpu.memory_space<vmem>>, vector<1x32xf32>
      %cst_110 = arith.constant dense<0.000000e+00> : vector<16xf32>
      %299 = vector.multi_reduction <add>, %292, %cst_110 [1] : vector<16x32xf32> to vector<16xf32>
      %300 = vector.shape_cast %299 : vector<16xf32> to vector<16x1xf32>
      %cst_111 = arith.constant 3.200000e+01 : f32
      %301 = vector.broadcast %cst_111 : f32 to vector<16x1xf32>
      %302 = arith.divf %300, %301 : vector<16x1xf32>
      %303 = vector.broadcast %302 : vector<16x1xf32> to vector<16x32xf32>
      %304 = arith.subf %292, %303 : vector<16x32xf32>
      %305 = arith.mulf %304, %304 : vector<16x32xf32>
      %cst_112 = arith.constant dense<0.000000e+00> : vector<16xf32>
      %306 = vector.multi_reduction <add>, %305, %cst_112 [1] : vector<16x32xf32> to vector<16xf32>
      %307 = vector.shape_cast %306 : vector<16xf32> to vector<16x1xf32>
      %cst_113 = arith.constant 3.200000e+01 : f32
      %308 = vector.broadcast %cst_113 : f32 to vector<16x1xf32>
      %309 = arith.divf %307, %308 : vector<16x1xf32>
      %310 = vector.broadcast %302 : vector<16x1xf32> to vector<16x32xf32>
      %311 = arith.subf %292, %310 : vector<16x32xf32>
      %cst_114 = arith.constant 9.99999974E-6 : f32
      %312 = vector.broadcast %cst_114 : f32 to vector<16x1xf32>
      %313 = arith.addf %309, %312 : vector<16x1xf32>
      %314 = math.rsqrt %313 : vector<16x1xf32>
      %315 = vector.broadcast %314 : vector<16x1xf32> to vector<16x32xf32>
      %316 = arith.mulf %311, %315 : vector<16x32xf32>
      %317 = vector.broadcast %297 : vector<1x32xf32> to vector<16x32xf32>
      %318 = arith.mulf %316, %317 : vector<16x32xf32>
      %319 = vector.broadcast %298 : vector<1x32xf32> to vector<16x32xf32>
      %320 = arith.addf %318, %319 : vector<16x32xf32>
      %321 = arith.truncf %320 : vector<16x32xf32> to vector<16x32xbf16>
      %c0_115 = arith.constant 0 : index
      %c0_116 = arith.constant 0 : index
      %322 = vector.load %arg17[%c0_115, %c0_116] : memref<32x128xbf16, #tpu.memory_space<vmem>>, vector<32x128xbf16>
      %cst_117 = arith.constant dense<0.000000e+00> : vector<16x128xf32>
      %323 = tpu.matmul %321, %322, %cst_117 {dimension_numbers = #tpu.dot_dimension_numbers<[1], [0], [0], [1], [0, 0, 1, 1], [], []>} : vector<16x32xbf16>, vector<32x128xbf16>, vector<16x128xf32> -> vector<16x128xf32>
      %c0_118 = arith.constant 0 : index
      %c0_119 = arith.constant 0 : index
      %324 = vector.load %arg18[%c0_118, %c0_119] : memref<16x128xf32, #tpu.memory_space<vmem>>, vector<16x128xf32>
      tpu.vector_store %arg18[%c0_118, %c0_119], %323 {strides = array<i32>} : memref<16x128xf32, #tpu.memory_space<vmem>>, vector<16x128xf32>,
    } else {
    }
    return
  }
  func.func @transform_0(%arg0: i32, %arg1: i32) -> (i32, i32) {
    %c0_i32 = arith.constant 0 : i32
    %c0_i32_0 = arith.constant 0 : i32
    return %arg0, %c0_i32 : i32, i32
  }
  func.func @transform_1(%arg0: i32, %arg1: i32) -> (i32, i32, i32) {
    %c0_i32 = arith.constant 0 : i32
    %c0_i32_0 = arith.constant 0 : i32
    %c0_i32_1 = arith.constant 0 : i32
    return %arg1, %c0_i32, %c0_i32_0 : i32, i32, i32
  }
  func.func @transform_2(%arg0: i32, %arg1: i32) -> (i32, i32, i32) {
    %c0_i32 = arith.constant 0 : i32
    %c0_i32_0 = arith.constant 0 : i32
    %c0_i32_1 = arith.constant 0 : i32
    return %arg1, %c0_i32, %c0_i32_0 : i32, i32, i32
  }
  func.func @transform_3(%arg0: i32, %arg1: i32) -> (i32, i32, i32) {
    %c0_i32 = arith.constant 0 : i32
    %c0_i32_0 = arith.constant 0 : i32
    %c0_i32_1 = arith.constant 0 : i32
    return %arg1, %c0_i32, %c0_i32_0 : i32, i32, i32
  }
  func.func @transform_4(%arg0: i32, %arg1: i32) -> (i32, i32, i32) {
    %c0_i32 = arith.constant 0 : i32
    %c0_i32_0 = arith.constant 0 : i32
    %c0_i32_1 = arith.constant 0 : i32
    return %arg1, %c0_i32, %c0_i32_0 : i32, i32, i32
  }
  func.func @transform_5(%arg0: i32, %arg1: i32) -> (i32, i32, i32) {
    %c0_i32 = arith.constant 0 : i32
    %c0_i32_0 = arith.constant 0 : i32
    %c0_i32_1 = arith.constant 0 : i32
    return %arg1, %c0_i32, %c0_i32_0 : i32, i32, i32
  }
  func.func @transform_6(%arg0: i32, %arg1: i32) -> (i32, i32, i32) {
    %c0_i32 = arith.constant 0 : i32
    %c0_i32_0 = arith.constant 0 : i32
    %c0_i32_1 = arith.constant 0 : i32
    return %arg1, %c0_i32, %c0_i32_0 : i32, i32, i32
  }
  func.func @transform_7(%arg0: i32, %arg1: i32) -> (i32, i32, i32) {
    %c0_i32 = arith.constant 0 : i32
    %c0_i32_0 = arith.constant 0 : i32
    %c0_i32_1 = arith.constant 0 : i32
    return %arg1, %c0_i32, %c0_i32_0 : i32, i32, i32
  }
  func.func @transform_8(%arg0: i32, %arg1: i32) -> (i32, i32, i32) {
    %c0_i32 = arith.constant 0 : i32
    %c0_i32_0 = arith.constant 0 : i32
    %c0_i32_1 = arith.constant 0 : i32
    return %arg1, %c0_i32, %c0_i32_0 : i32, i32, i32
  }
  func.func @transform_9(%arg0: i32, %arg1: i32) -> (i32, i32, i32) {
    %c0_i32 = arith.constant 0 : i32
    %c0_i32_0 = arith.constant 0 : i32
    %c0_i32_1 = arith.constant 0 : i32
    return %arg1, %c0_i32, %c0_i32_0 : i32, i32, i32
  }
  func.func @transform_10(%arg0: i32, %arg1: i32) -> (i32, i32, i32) {
    %c0_i32 = arith.constant 0 : i32
    %c0_i32_0 = arith.constant 0 : i32
    %c0_i32_1 = arith.constant 0 : i32
    return %arg1, %c0_i32, %c0_i32_0 : i32, i32, i32
  }
  func.func @transform_11(%arg0: i32, %arg1: i32) -> (i32, i32, i32) {
    %c0_i32 = arith.constant 0 : i32
    %c0_i32_0 = arith.constant 0 : i32
    %c0_i32_1 = arith.constant 0 : i32
    return %arg1, %c0_i32, %c0_i32_0 : i32, i32, i32
  }
  func.func @transform_12(%arg0: i32, %arg1: i32) -> (i32, i32, i32) {
    %c0_i32 = arith.constant 0 : i32
    %c0_i32_0 = arith.constant 0 : i32
    %c0_i32_1 = arith.constant 0 : i32
    return %arg1, %c0_i32, %c0_i32_0 : i32, i32, i32
  }
  func.func @transform_13(%arg0: i32, %arg1: i32) -> (i32, i32) {
    %c0_i32 = arith.constant 0 : i32
    %c0_i32_0 = arith.constant 0 : i32
    %c0_i32_1 = arith.constant 0 : i32
    return %c0_i32, %c0_i32_0 : i32, i32
  }
  func.func @transform_14(%arg0: i32, %arg1: i32) -> (i32, i32) {
    %c0_i32 = arith.constant 0 : i32
    %c0_i32_0 = arith.constant 0 : i32
    %c0_i32_1 = arith.constant 0 : i32
    return %c0_i32, %c0_i32_0 : i32, i32
  }
  func.func @transform_15(%arg0: i32, %arg1: i32) -> (i32, i32) {
    %c0_i32 = arith.constant 0 : i32
    %c0_i32_0 = arith.constant 0 : i32
    %c0_i32_1 = arith.constant 0 : i32
    return %c0_i32, %c0_i32_0 : i32, i32
  }
  func.func @transform_16(%arg0: i32, %arg1: i32) -> (i32, i32) {
    %c0_i32 = arith.constant 0 : i32
    %c0_i32_0 = arith.constant 0 : i32
    return %arg0, %c0_i32 : i32, i32
  }
}

</mosaic_0001>

<bundles_post_ra>
// kernel: tpu_custom_call.1
= control target key start
LH: loop header
LB: loop body
LE: loop exit
PB: predicated region body
PF: predicated region fallthrough
CT: control target
= control target key end

     0   :  { %s3379_s0 = inlined_call_operand.vmem [shape: f32[16,32], index: 0, kind: input, shape index: {}]   ;;  %s3380_s1 = inlined_call_operand.vmem [shape: f32[2,1,32], index: 1, kind: input, shape index: {}]   ;;  %s3381_s2 = inlined_call_operand.vmem [shape: f32[2,1,32], index: 2, kind: input, shape index: {}]   ;;  %s3382_s3 = inlined_call_operand.vmem [shape: bf16[2,32,96], index: 3, kind: input, shape index: {}]   ;;  %s3383_s4 = inlined_call_operand.vmem [shape: f32[2,1,96], index: 4, kind: input, shape index: {}]   ;;  %s3384_s5 = inlined_call_operand.vmem [shape: bf16[2,32,32], index: 5, kind: input, shape index: {}]   ;;  %s3385_s6 = inlined_call_operand.vmem [shape: f32[2,1,32], index: 6, kind: input, shape index: {}]   ;;  %s3386_s7 = inlined_call_operand.vmem [shape: f32[2,1,32], index: 7, kind: input, shape index: {}]   ;;  %s3387_s8 = inlined_call_operand.vmem [shape: f32[2,1,32], index: 8, kind: input, shape index: {}]   ;;  %s3388_s9 = inlined_call_operand.vmem [shape: bf16[2,32,128], index: 9, kind: input, shape index: {}]   ;;  %s3389_s10 = inlined_call_operand.vmem [shape: f32[2,1,128], index: 10, kind: input, shape index: {}]   ;;  %s3390_s11 = inlined_call_operand.vmem [shape: bf16[2,128,32], index: 11, kind: input, shape index: {}]   ;;  %s3391_s12 = inlined_call_operand.vmem [shape: f32[2,1,32], index: 12, kind: input, shape index: {}]   ;;  %s3392_s13 = inlined_call_operand.vmem [shape: f32[1,32], index: 13, kind: input, shape index: {}]   ;;  %s3393_s14 = inlined_call_operand.vmem [shape: f32[1,32], index: 14, kind: input, shape index: {}]   ;;  %s3394_s15 = inlined_call_operand.vmem [shape: bf16[32,128], index: 15, kind: input, shape index: {}]   ;;  %s3395_s16 = inlined_call_operand.hbm [shape: f32[16,128], index: 16, kind: output, shape index: {}]  }
   0x1   :  { %3400 = sst [smem:[#allocation9_spill]] %s3379_s0 }
   0x2   :  { %3401 = sst [smem:[#allocation10_spill]] %s3382_s3 }
   0x3   :  { %3402 = sst [smem:[#allocation11_spill]] %s3384_s5 }
   0x4   :  { %3403 = sst [smem:[#allocation12_spill]] %s3392_s13 }
   0x5   :  { %3404 = sst [smem:[#allocation13_spill]] %s3393_s14 }
   0x6   :  { %3405 = sst [smem:[#allocation14_spill]] %s3394_s15 }
   0x7   :  { %3406 = sst [smem:[#allocation15_spill]] %s3395_s16 }
   0x8   :  { %21 = vsyncpa [#allocation4], 0  ;;  %s2950_s21 = smov 0   ;;  %s2952_s22 = smov 0  }
   0x9   :  { %s2954_s23 = smov 0  }
   0xa LB: > { %3407 = sst [smem:[#allocation6_spill]] %s2839_s22  ;;  %s36_s25 = sadd.s32 1, %s2839_s22  ;;  %s2843_s23 = sphi %s2954_s23, %s27_s23   ;;  %s2839_s22 = sphi %s2952_s22, %s3428_s22   ;;  %s2835_s21 = sphi %s2950_s21, %s3427_s21  }
   0xb   : > { %3408 = sst [smem:[#allocation7_spill]] %s2843_s23  ;;  %p37_p0 = scmp.ge.s32.totalorder %s36_s25, 2 }
   0xc   : > { %p2398_p1 = scmp.ge.s32.totalorder %s2843_s23, 1  ;;  %p580_p2 = scmp.lt.s32.totalorder %s2843_s23, 3 }
   0xd   : > { %s3430_s25 = smov (%p37_p0, %s36_s25), 0 }
   0xe   : > { %3409 = sst [smem:[#allocation8_spill]] %s3430_s25  ;;  %p581_p3 = pnand %p2398_p1, %p580_p2 }
   0xf   : > { %p675_p4 = scmp.lt.s32.totalorder (!%p581_p3), %s2835_s21, 1  ;;  %s3410_s3 = sld [smem:[#allocation10_spill]] (!%p581_p3) }
  0x10   : > { %584 = sbr.rel (%p581_p3) target bundleno = 3099 (0xc1b), region = 84  ;;  %s3411_s5 = sld [smem:[#allocation11_spill]] (!%p581_p3) }
  0x11   : > { %p2407_p5 = scmp.ne.s32.totalorder (!%p581_p3), %s2835_s21, 0 }
  0x15   : > { %s2973_s26 = scalar_select %p675_p4, %s2835_s21, 1 }
  0x16   : > { %s3412_s27 = sld [smem:[#allocation9_spill]] (!%p2407_p5) }
  0x17   : > { %s2459_s18 = sshll.u32 %s2973_s26, 4  ;;  %s699_s13 = scalar_lea.vmem %s3386_s7, %s2973_s26 }
  0x18   : > { %s2991_s25 = scalar_lea.vmem %s3410_s3, %s2459_s18  ;;  %s2996_s23 = scalar_lea.vmem %s3411_s5, %s2459_s18 }
  0x19   : > { %s702_s24 = scalar_lea.vmem %s3387_s8, %s2973_s26  ;;  %s3013_s3 = scalar_lea.vmem %s3388_s9, %s2459_s18 }
  0x1a   : > { %s710_s5 = scalar_lea.vmem %s3389_s10, %s2973_s26  ;;  %s2462_s15 = sshll.u32 %s2973_s26, 6 }
  0x1b   : > { %s3023_s30 = scalar_lea.vmem %s3390_s11, %s2462_s15  ;;  %s718_s19 = scalar_lea.vmem %s3391_s12, %s2973_s26 }
  0x1c   : > { %724 = sbr.rel (%p2407_p5) target bundleno = 35 (0x23), region = 88 }
  0x21   : > { %v725_v0 = vld [vmem:[%s3412_s27] sm:$0xff]  ;;  %vm727_vm0 = vcmask 261120   ;;  %v726_v1 = vld [vmem:[%s3412_s27 + $0x8] sm:$0xff] }
  0x22   : > { %728 = vst.msk [vmem:[#allocation2] sm:$0xff] %vm727_vm0, %v725_v0  ;;  %729 = vst.msk [vmem:[#allocation2 + $0x8] sm:$0xff] %vm727_vm0, %v726_v1 }
  0x23 PF: > { %vm734_vm1 = vcmask 261120   ;;  %v2729_v16 = vld [vmem:[%s2991_s25 + $0x8] sm:$0xff]   ;;  %v2845_v17 = vmov 0.0   ;;  %vm2846_vm2 = vmmov 0   ;;  %v2730_v18 = vld [vmem:[%s2991_s25] sm:$0xff]   ;;  %s3413_s22 = scalar_lea.vmem %s3380_s1, %s2973_s26  ;;  %s3414_s17 = scalar_lea.vmem %s3381_s2, %s2973_s26  ;;  %vm855_vm3 = vcmask 64512  }
  0x24   : > { %2516 = vmatprep.subr.bf16.mxu0 %v2845_v17  ;;  %2520 = vmatprep.mubr.msk.bf16.mxu0 %vm2846_vm2, %v2845_v17  ;;  %v2408_v27 = vld [vmem:[%s3413_s22] ss:$0 sm:$0xff]  ;;  %s3415_s18 = scalar_lea.vmem %s3383_s4, %s2973_s26  ;;  %s2847_s28 = smov 88   ;;  %vm921_vm5 = vcmask 1043456   ;;  %vm1314_vm6 = vcmask 130048   ;;  %vm1316_vm7 = vcmask 195584  }
  0x25   : > { %2517 = vmatpush3.bf16.msra.mxu0 %v2729_v16  ;;  %2536 = vmatprep.subr.bf16.mxu1 %v2845_v17  ;;  %v2409_v31 = vld [vmem:[%s3414_s17] ss:$0 sm:$0xff]  ;;  %s2848_s16 = smov 96   ;;  %s2849_s15 = smov 120  }
  0x26   : > { %2518 = vmatprep.subr.bf16.mxu0 %v2845_v17  ;;  %2538 = vmatprep.mubr.msk.bf16.mxu1 %vm2846_vm2, %v2845_v17  ;;  %v2410_v36 = vld [vmem:[%s3415_s18] ss:$0 sm:$0xff]  ;;  %s2850_s25 = smov 112   ;;  %s2851_s22 = smov 80  }
  0x27   : > { %s2852_s14 = smov 104   ;;  %s2853_s29 = smov 72  }
  0x28   : > { %s2854_s17 = smov 56   ;;  %s2855_s0 = smov 64  }
  0x29   : > { %v3036_v2 = vld [vmem:[#allocation2] sm:$0xff]  ;;  %v3038_v3 = vld [vmem:[#allocation2 + $0x8] sm:$0xff]  ;;  %2519 = vmatpush3.bf16.msra.mxu0 %v2730_v18  ;;  %s2856_s20 = smov 48   ;;  %s2857_s18 = smov 40  }
  0x2a   : > { %v735_v4 = vsel %vm734_vm1, %v3036_v2, 0.0  ;;  %v738_v5 = vsel %vm734_vm1, %v3038_v3, 0.0  ;;  %2524 = vmatprep.subr.bf16.mxu0 %v2845_v17  ;;  %p2449_p6 = scmp.ne.s32.totalorder %s2835_s21, 1 }
  0x2b   : > { %736 = vadd.xlane.f32.xlu0 %v735_v4 }
  0x2f   : > { %739 = vadd.xlane.f32.xlu0 %v738_v5  ;;  %v846_v5 = vlaneseq }
  0xb4   : > { %v737_v6 = vpop.xlane.xlu0 %736 }
  0xb5   : > { %v742_v7 = vmul.f32 0.03125, %v737_v6  ;;  %v847_v6 = vshrl.u32 %v846_v5, 7 }
  0xb7   : > { %v744_v8 = vsub.f32 %v3036_v2, %v742_v7  ;;  %v849_v7 = vand.u32 127, %v846_v5 }
  0xb8   : > { %v740_v9 = vpop.xlane.xlu0 %739 }
  0xb9   : > { %v743_v10 = vmul.f32 0.03125, %v740_v9  ;;  %v746_v11 = vmul.f32 %v744_v8, %v744_v8  ;;  %vm3136_vm4 = vcmp.le.s32.totalorder %v849_v7, %v847_v6 }
  0xbb   : > { %v745_v12 = vsub.f32 %v3038_v3, %v743_v10  ;;  %v748_v13 = vsel %vm734_vm1, %v746_v11, 0.0 }
  0xbc   : > { %749 = vadd.xlane.f32.xlu1 %v748_v13 }
  0xbd   : > { %v747_v14 = vmul.f32 %v745_v12, %v745_v12 }
  0xbf   : > { %v751_v15 = vsel %vm734_vm1, %v747_v14, 0.0 }
  0xc0   : > { %752 = vadd.xlane.f32.xlu1 %v751_v15 }
 0x145   : > { %v750_v19 = vpop.xlane.xlu1 %749 }
 0x146   : > { %v754_v20 = vmul.f32 0.03125, %v750_v19 }
 0x148   : > { %v756_v21 = vadd.f32 1e-05, %v754_v20 }
 0x149   : > { %v753_v22 = vpop.xlane.xlu1 %752 }
 0x14a   : > { %2743 = vrsqrt.f32 %v756_v21  ;;  %v755_v23 = vmul.f32 0.03125, %v753_v22 }
 0x14c   : > { %v757_v24 = vadd.f32 1e-05, %v755_v23 }
 0x14e   : > { %2745 = vrsqrt.f32 %v757_v24 }
 0x157   : > { %v2744_v25 = vpop.eup %2743 }
 0x158   : > { %v760_v26 = vmul.f32 %v2744_v25, %v744_v8 }
 0x15a   : > { %v768_v30 = vmul.f32 %v2408_v27, %v760_v26 }
 0x15b   : > { %v2746_v28 = vpop.eup %2745 }
 0x15c   : > { %v761_v29 = vmul.f32 %v2746_v28, %v745_v12  ;;  %v776_v33 = vadd.f32 %v2409_v31, %v768_v30 }
 0x15e   : > { %v769_v32 = vmul.f32 %v2408_v27, %v761_v29 }
 0x160   : > { %v777_v34 = vadd.f32 %v2409_v31, %v769_v32 }
 0x162   : > { %v778_v35 = vpack.c.bf16 %v777_v34, %v776_v33 }
 0x164   : > { %2521 = vmatmul.mubr.msk.bf16.vlgmr.msra.gmra.mxu0 %vm734_vm1, %v778_v35 }
 0x165   : > { %2526 = vmatprep.mubr.msk.bf16.mxu0 %vm2846_vm2, %v2845_v17 }
 0x224   : > { %v839_v37 = vpop.f32.mrf.mxu0 }
 0x225   : > { %v840_v38 = vadd.f32 %v2410_v36, %v839_v37 }
 0x226   : > { %v2522_v39 = vpop.f32.mrf.mxu0 }
 0x227   : > { %v3076_v40 = vpack.c.bf16 %v840_v38, %v840_v38 }
 0x228   : > { %v842_v41 = vpop.f32.mrf.mxu0 }
 0x229   : > { %967 = vrot.lane.b32.xlu1 %v3076_v40, %s2847_s28  ;;  %853 = vrot.lane.b32.xlu0 %v3076_v40, %s2848_s16  ;;  %v843_v43 = vadd.f32 %v2410_v36, %v842_v41 }
 0x22a   : > { %v2523_v42 = vpop.f32.mrf.mxu0 }
 0x22b   : > { %v3084_v44 = vpack.c.bf16 %v843_v43, %v843_v43 }
 0x22d   : > { %965 = vrot.lane.b32.xlu1 %v3076_v40, %s2849_s15  ;;  %1077 = vrot.lane.b32.xlu0 %v3076_v40, %s2850_s25 }
 0x231   : > { %1079 = vrot.lane.b32.xlu1 %v3076_v40, %s2851_s22  ;;  %1189 = vrot.lane.b32.xlu0 %v3076_v40, %s2852_s14 }
 0x235   : > { %1191 = vrot.lane.b32.xlu1 %v3076_v40, %s2853_s29  ;;  %1432 = vrot.lane.b32.xlu0 %v3084_v44, %s2847_s28  ;;  %s2858_s28 = smov 8  }
 0x239   : > { %1544 = vrot.lane.b32.xlu0 %v3084_v44, %s2851_s22  ;;  %1320 = vrot.lane.b32.xlu1 %v3084_v44, %s2848_s16  ;;  %s2859_s16 = smov 16   ;;  %s3418_s22 = scalar_lea.vmem %s3385_s6, %s2973_s26 }
 0x23d   : > { %1656 = vrot.lane.b32.xlu0 %v3084_v44, %s2853_s29  ;;  %1430 = vrot.lane.b32.xlu1 %v3084_v44, %s2849_s15  ;;  %s2860_s15 = smov 24  }
 0x241   : > { %1542 = vrot.lane.b32.xlu1 %v3084_v44, %s2850_s25 }
 0x245   : > { %1654 = vrot.lane.b32.xlu1 %v3084_v44, %s2852_s14 }
 0x29b   : > { %v968_v45 = vpop.permute.xlu1 %967  ;;  %v854_v46 = vpop.permute.xlu0 %853 }
 0x29c   : > { %v860_v47 = vsel %vm855_vm3, %v854_v46, 0  ;;  %v973_v48 = vsel %vm855_vm3, %v968_v45, 0 }
 0x29d   : > { %2525 = vmatpush3.bf16.xpose.msra.mxu0 %v860_v47  ;;  %2537 = vmatpush3.bf16.xpose.msra.mxu1 %v973_v48 }
 0x29e   : > { %2548 = vmatprep.subr.bf16.mxu1 %v2845_v17  ;;  %2530 = vmatprep.subr.bf16.mxu0 %v2845_v17 }
 0x29f   : > { %v966_v49 = vpop.permute.xlu1 %965  ;;  %v1078_v53 = vpop.permute.xlu0 %1077 }
 0x2a3   : > { %v1080_v50 = vpop.permute.xlu1 %1079  ;;  %v1190_v56 = vpop.permute.xlu0 %1189 }
 0x2a4   : > { %v1085_v51 = vsel %vm855_vm3, %v1080_v50, 0  ;;  %2527 = vmatmul.mubr.msk.bf16.vlgmr.msra.gmra.mxu0 %vm855_vm3, %v3076_v40  ;;  %2539 = vmatmul.mubr.msk.bf16.vlgmr.msra.gmra.mxu1 %vm855_vm3, %v966_v49 }
 0x2a5   : > { %2549 = vmatpush3.bf16.xpose.msra.mxu1 %v1085_v51  ;;  %2550 = vmatprep.mubr.msk.bf16.mxu1 %vm2846_vm2, %v2845_v17 }
 0x2a6   : > { %2560 = vmatprep.subr.bf16.mxu1 %v2845_v17  ;;  %2532 = vmatprep.mubr.msk.bf16.mxu0 %vm2846_vm2, %v2845_v17 }
 0x2a7   : > { %v1192_v52 = vpop.permute.xlu1 %1191  ;;  %v1433_v58 = vpop.permute.xlu0 %1432 }
 0x2a8   : > { %v1197_v54 = vsel %vm855_vm3, %v1192_v52, 0  ;;  %v1438_v59 = vsel %vm855_vm3, %v1433_v58, 0 }
 0x2ab   : > { %v1321_v55 = vpop.permute.xlu1 %1320  ;;  %v1545_v60 = vpop.permute.xlu0 %1544 }
 0x2ac   : > { %2551 = vmatmul.mubr.msk.bf16.vlgmr.msra.gmra.mxu1 %vm855_vm3, %v1078_v53  ;;  %v1326_v57 = vsel %vm855_vm3, %v1321_v55, 0  ;;  %v1550_v62 = vsel %vm855_vm3, %v1545_v60, 0 }
 0x2ad   : > { %2561 = vmatpush3.bf16.xpose.msra.mxu1 %v1197_v54  ;;  %2562 = vmatprep.mubr.msk.bf16.mxu1 %vm2846_vm2, %v2845_v17 }
 0x2ae   : > { %2572 = vmatprep.subr.bf16.mxu1 %v2845_v17 }
 0x2af   : > { %v1431_v61 = vpop.permute.xlu1 %1430  ;;  %v1657_v63 = vpop.permute.xlu0 %1656 }
 0x2b0   : > { %v1662_v1 = vsel %vm855_vm3, %v1657_v63, 0 }
 0x2b3   : > { %v1543_v0 = vpop.permute.xlu1 %1542 }
 0x2b4   : > { %2563 = vmatmul.mubr.msk.bf16.vlgmr.msra.gmra.mxu1 %vm855_vm3, %v1190_v56 }
 0x2b5   : > { %2573 = vmatpush3.bf16.xpose.msra.mxu1 %v1326_v57  ;;  %2574 = vmatprep.mubr.msk.bf16.mxu1 %vm2846_vm2, %v2845_v17 }
 0x2b6   : > { %2584 = vmatprep.subr.bf16.mxu1 %v2845_v17 }
 0x2b7   : > { %v1655_v4 = vpop.permute.xlu1 %1654 }
 0x2bc   : > { %2575 = vmatmul.mubr.msk.bf16.vlgmr.msra.gmra.mxu1 %vm855_vm3, %v3084_v44 }
 0x2bd   : > { %2585 = vmatpush3.bf16.xpose.msra.mxu1 %v1438_v59  ;;  %2586 = vmatprep.mubr.msk.bf16.mxu1 %vm2846_vm2, %v2845_v17 }
 0x2be   : > { %2596 = vmatprep.subr.bf16.mxu1 %v2845_v17 }
 0x2c4   : > { %2587 = vmatmul.mubr.msk.bf16.vlgmr.msra.gmra.mxu1 %vm855_vm3, %v1431_v61 }
 0x2c5   : > { %2597 = vmatpush3.bf16.xpose.msra.mxu1 %v1550_v62  ;;  %2598 = vmatprep.mubr.msk.bf16.mxu1 %vm2846_vm2, %v2845_v17 }
 0x2c6   : > { %2608 = vmatprep.subr.bf16.mxu1 %v2845_v17 }
 0x2cc   : > { %2599 = vmatmul.mubr.msk.bf16.vlgmr.msra.gmra.mxu1 %vm855_vm3, %v1543_v0 }
 0x2cd   : > { %2609 = vmatpush3.bf16.xpose.msra.mxu1 %v1662_v1  ;;  %2610 = vmatprep.mubr.msk.bf16.mxu1 %vm2846_vm2, %v2845_v17 }
 0x2ce   : > { %2620 = vmatprep.subr.bf16.mxu1 %v2845_v17 }
 0x2d4   : > { %2611 = vmatmul.mubr.msk.bf16.vlgmr.msra.gmra.mxu1 %vm855_vm3, %v1655_v4 }
 0x2d5   : > { %2624 = vmatprep.mubr.msk.bf16.mxu1 %vm2846_vm2, %v2845_v17 }
 0x364   : > { %v896_v8 = vpop.f32.mrf.mxu0  ;;  %v1009_v9 = vpop.f32.mrf.mxu1 }
 0x365   : > { %v902_v11 = vmul.f32 0.35355338, %v896_v8  ;;  %v1015_v12 = vmul.f32 0.35355338, %v1009_v9 }
 0x366   : > { %v2528_v13 = vpop.f32.mrf.mxu0  ;;  %v2540_v14 = vpop.f32.mrf.mxu1 }
 0x367   : > { %v3142_v15 = vsel %vm3136_vm4, %v1015_v12, -1e+30  ;;  %v3146_v16 = vsel %vm3136_vm4, %v902_v11, -1e+30 }
 0x368   : > { %v899_v18 = vpop.f32.mrf.mxu0  ;;  %v1012_v19 = vpop.f32.mrf.mxu1  ;;  %v1017_v20 = vsel %vm855_vm3, %v3142_v15, -inf  ;;  %v904_v21 = vsel %vm855_vm3, %v3146_v16, -inf }
 0x369   : > { %1018 = vmax.xlane.f32.xlu1 %v1017_v20  ;;  %905 = vmax.xlane.f32.xlu0 %v904_v21 }
 0x36a   : > { %v2529_v22 = vpop.f32.mrf.mxu0  ;;  %v2541_v23 = vpop.f32.mrf.mxu1 }
 0x36c   : > { %v1121_v24 = vpop.f32.mrf.mxu1 }
 0x36d   : > { %v1127_v47 = vmul.f32 0.35355338, %v1121_v24 }
 0x36e   : > { %v2552_v25 = vpop.f32.mrf.mxu1 }
 0x36f   : > { %v1128_v51 = vsel %vm3136_vm4, %v1127_v47, -1e+30 }
 0x370   : > { %v1124_v26 = vpop.f32.mrf.mxu1  ;;  %v1129_v57 = vsel %vm855_vm3, %v1128_v51, -inf }
 0x372   : > { %v2553_v27 = vpop.f32.mrf.mxu1 }
 0x374   : > { %v1233_v28 = vpop.f32.mrf.mxu1 }
 0x375   : > { %v1239_v52 = vmul.f32 0.35355338, %v1233_v28 }
 0x376   : > { %v2564_v29 = vpop.f32.mrf.mxu1 }
 0x377   : > { %v1240_v60 = vsel %vm3136_vm4, %v1239_v52, -1e+30 }
 0x378   : > { %v1236_v30 = vpop.f32.mrf.mxu1  ;;  %v1241_v62 = vsel %vm855_vm3, %v1240_v60, -inf }
 0x37a   : > { %v2565_v31 = vpop.f32.mrf.mxu1  ;;  %1029 = vrot.lane.b32.xlu1 %v3076_v40, %s2854_s17 }
 0x37c   : > { %v1362_v32 = vpop.f32.mrf.mxu1 }
 0x37d   : > { %v1368_v58 = vmul.f32 0.35355338, %v1362_v32 }
 0x37e   : > { %v2576_v33 = vpop.f32.mrf.mxu1 }
 0x37f   : > { %916 = vrot.lane.b32.xlu0 %v3076_v40, %s2855_s0  ;;  %v1369_v0 = vsel %vm3136_vm4, %v1368_v58, -1e+30 }
 0x380   : > { %v1365_v34 = vpop.f32.mrf.mxu1  ;;  %v1370_v1 = vsel %vm855_vm3, %v1369_v0, -inf }
 0x382   : > { %v2577_v35 = vpop.f32.mrf.mxu1 }
 0x384   : > { %v1474_v36 = vpop.f32.mrf.mxu1 }
 0x385   : > { %v1480_v48 = vmul.f32 0.35355338, %v1474_v36 }
 0x386   : > { %v2588_v37 = vpop.f32.mrf.mxu1 }
 0x387   : > { %v1481_v55 = vsel %vm3136_vm4, %v1480_v48, -1e+30 }
 0x388   : > { %v1477_v38 = vpop.f32.mrf.mxu1  ;;  %v1482_v56 = vsel %vm855_vm3, %v1481_v55, -inf }
 0x38a   : > { %v2589_v39 = vpop.f32.mrf.mxu1 }
 0x38c   : > { %v1586_v41 = vpop.f32.mrf.mxu1 }
 0x38d   : > { %v1592_v63 = vmul.f32 0.35355338, %v1586_v41 }
 0x38e   : > { %v2600_v42 = vpop.f32.mrf.mxu1 }
 0x38f   : > { %v1593_v4 = vsel %vm3136_vm4, %v1592_v63, -1e+30 }
 0x390   : > { %v1589_v43 = vpop.f32.mrf.mxu1  ;;  %v1594_v5 = vsel %vm855_vm3, %v1593_v4, -inf }
 0x392   : > { %v2601_v45 = vpop.f32.mrf.mxu1 }
 0x394   : > { %v1698_v46 = vpop.f32.mrf.mxu1 }
 0x395   : > { %v1704_v53 = vmul.f32 0.35355338, %v1698_v46 }
 0x396   : > { %v2612_v49 = vpop.f32.mrf.mxu1 }
 0x397   : > { %v3164_v59 = vsel %vm3136_vm4, %v1704_v53, -1e+30 }
 0x398   : > { %v1701_v50 = vpop.f32.mrf.mxu1  ;;  %v1706_v61 = vsel %vm855_vm3, %v3164_v59, -inf }
 0x39a   : > { %v2613_v54 = vpop.f32.mrf.mxu1 }
 0x39e   : > { %1483 = vmax.xlane.f32.xlu1 %v1482_v56  ;;  %1130 = vmax.xlane.f32.xlu0 %v1129_v57 }
 0x3a2   : > { %1707 = vmax.xlane.f32.xlu1 %v1706_v61  ;;  %1242 = vmax.xlane.f32.xlu0 %v1241_v62 }
 0x3a6   : > { %1371 = vmax.xlane.f32.xlu0 %v1370_v1 }
 0x3aa   : > { %1595 = vmax.xlane.f32.xlu0 %v1594_v5 }
 0x3c0   : > { %1141 = vrot.lane.b32.xlu0 %v3076_v40, %s2856_s20 }
 0x3f2   : > { %v1019_v6 = vpop.xlane.xlu1 %1018  ;;  %v906_v7 = vpop.xlane.xlu0 %905 }
 0x3f3   : > { %v1020_v8 = vsub.f32 %v3142_v15, %v1019_v6  ;;  %v907_v9 = vsub.f32 %v3146_v16, %v906_v7 }
 0x3f5   : > { %v1021_v11 = vmul.f32 1.442695, %v1020_v8  ;;  %v908_v12 = vmul.f32 1.442695, %v907_v9 }
 0x3f6   : > { %v917_v13 = vpop.permute.xlu0 %916  ;;  %v1030_v20 = vpop.permute.xlu1 %1029 }
 0x3f7   : > { %2747 = vpow2.f32 %v1021_v11  ;;  %v923_v10 = vsel %vm921_vm5, %v917_v13, 0  ;;  %v1035_v58 = vsel %vm921_vm5, %v1030_v20, 0 }
 0x3f8   : > { %2749 = vpow2.f32 %v908_v12  ;;  %2531 = vmatpush3.bf16.msra.mxu0 %v923_v10 }
 0x3f9   : > { %2542 = vmatprep.subr.bf16.mxu0 %v2845_v17 }
 0x404   : > { %v3183_v14 = vpop.eup %2747 }
 0x405   : > { %v2750_v18 = vpop.eup %2749  ;;  %v1023_v19 = vsel %vm855_vm3, %v3183_v14, 0.0 }
 0x406   : > { %1024 = vadd.xlane.f32.xlu1 %v1023_v19  ;;  %v910_v15 = vsel %vm855_vm3, %v2750_v18, 0.0 }
 0x407   : > { %911 = vadd.xlane.f32.xlu0 %v910_v15 }
 0x417   : > { %1382 = vrot.lane.b32.xlu1 %v3084_v44, %s2855_s0 }
 0x427   : > { %v1131_v16 = vpop.xlane.xlu0 %1130  ;;  %v1484_v24 = vpop.xlane.xlu1 %1483 }
 0x428   : > { %v1132_v21 = vsub.f32 %v1128_v51, %v1131_v16  ;;  %v1485_v27 = vsub.f32 %v1481_v55, %v1484_v24 }
 0x42a   : > { %v1133_v22 = vmul.f32 1.442695, %v1132_v21  ;;  %v1486_v31 = vmul.f32 1.442695, %v1485_v27 }
 0x42b   : > { %v1243_v23 = vpop.xlane.xlu0 %1242  ;;  %v1708_v45 = vpop.xlane.xlu1 %1707 }
 0x42c   : > { %v1244_v25 = vsub.f32 %v1240_v60, %v1243_v23  ;;  %2751 = vpow2.f32 %v1133_v22  ;;  %v1709_v46 = vsub.f32 %v3164_v59, %v1708_v45 }
 0x42e   : > { %v1245_v26 = vmul.f32 1.442695, %v1244_v25  ;;  %v1710_v47 = vmul.f32 1.442695, %v1709_v46 }
 0x42f   : > { %v1372_v28 = vpop.xlane.xlu0 %1371 }
 0x430   : > { %v1373_v29 = vsub.f32 %v1369_v0, %v1372_v28  ;;  %2753 = vpow2.f32 %v1245_v26 }
 0x432   : > { %v1374_v30 = vmul.f32 1.442695, %v1373_v29 }
 0x433   : > { %v1596_v41 = vpop.xlane.xlu0 %1595 }
 0x434   : > { %2755 = vpow2.f32 %v1374_v30  ;;  %v1597_v42 = vsub.f32 %v1593_v4, %v1596_v41 }
 0x435   : > { %2757 = vpow2.f32 %v1486_v31 }
 0x436   : > { %v1598_v43 = vmul.f32 1.442695, %v1597_v42 }
 0x437   : > { %v1142_v51 = vpop.permute.xlu0 %1141 }
 0x438   : > { %2759 = vpow2.f32 %v1598_v43  ;;  %v1147_v60 = vsel %vm921_vm5, %v1142_v51, 0 }
 0x439   : > { %v2752_v32 = vpop.eup %2751  ;;  %2761 = vpow2.f32 %v1710_v47 }
 0x43a   : > { %v1135_v33 = vsel %vm855_vm3, %v2752_v32, 0.0 }
 0x43b   : > { %1136 = vadd.xlane.f32.xlu0 %v1135_v33 }
 0x43d   : > { %v3191_v34 = vpop.eup %2753 }
 0x43e   : > { %v1247_v35 = vsel %vm855_vm3, %v3191_v34, 0.0 }
 0x43f   : > { %1248 = vadd.xlane.f32.xlu1 %v1247_v35 }
 0x441   : > { %v3195_v36 = vpop.eup %2755 }
 0x442   : > { %v1376_v37 = vsel %vm855_vm3, %v3195_v36, 0.0  ;;  %v3199_v38 = vpop.eup %2757 }
 0x443   : > { %1377 = vadd.xlane.f32.xlu1 %v1376_v37  ;;  %v1488_v39 = vsel %vm855_vm3, %v3199_v38, 0.0 }
 0x445   : > { %v3207_v48 = vpop.eup %2759 }
 0x446   : > { %v1600_v49 = vsel %vm855_vm3, %v3207_v48, 0.0  ;;  %v3211_v50 = vpop.eup %2761 }
 0x447   : > { %1489 = vadd.xlane.f32.xlu1 %v1488_v39 }
 0x451   : > { %1253 = vrot.lane.b32.xlu0 %v3076_v40, %s2857_s18  ;;  %v1712_v40 = vsel %vm855_vm3, %v3211_v50, 0.0 }
 0x458   : > { %1494 = vrot.lane.b32.xlu1 %v3084_v44, %s2854_s17 }
 0x470   : > { %1601 = vadd.xlane.f32.xlu0 %v1600_v49 }
 0x47c   : > { %1713 = vadd.xlane.f32.xlu1 %v1712_v40 }
 0x486   : > { %1606 = vrot.lane.b32.xlu0 %v3084_v44, %s2856_s20 }
 0x48d   : > { %1718 = vrot.lane.b32.xlu1 %v3084_v44, %s2857_s18 }
 0x48f   : > { %v1025_v53 = vpop.xlane.xlu1 %1024 }
 0x490   : > { %v912_v52 = vpop.xlane.xlu0 %911 }
 0x491   : > { %2763 = vrcp.f32 %v912_v52 }
 0x492   : > { %2765 = vrcp.f32 %v1025_v53 }
 0x493   : > { %v1383_v61 = vpop.permute.xlu1 %1382 }
 0x494   : > { %v1388_v10 = vsel %vm921_vm5, %v1383_v61, 0 }
 0x49e   : > { %v2764_v54 = vpop.eup %2763 }
 0x49f   : > { %v914_v55 = vmul.f32 %v2764_v54, %v2750_v18  ;;  %v2766_v57 = vpop.eup %2765 }
 0x4a0   : > { %v1027_v44 = vmul.f32 %v2766_v57, %v3183_v14 }
 0x4a1   : > { %v915_v56 = vpack.c.bf16 %v914_v55, %v914_v55 }
 0x4a2   : > { %v1028_v59 = vpack.c.bf16 %v1027_v44, %v1027_v44 }
 0x4a3   : > { %2533 = vmatmul.mubr.msk.bf16.vlgmr.msra.gmra.mxu0 %vm855_vm3, %v915_v56 }
 0x4a4   : > { %2543 = vmatpush3.bf16.msra.mxu0 %v1035_v58  ;;  %2544 = vmatprep.mubr.msk.bf16.mxu0 %vm2846_vm2, %v2845_v17 }
 0x4a5   : > { %2554 = vmatprep.subr.bf16.mxu0 %v2845_v17 }
 0x4ab   : > { %2545 = vmatmul.mubr.msk.bf16.vlgmr.msra.gmra.mxu0 %vm855_vm3, %v1028_v59  ;;  %v2731_v59 = vld [vmem:[%s2996_s23 + $0x8] sm:$0xff]  }
 0x4ac   : > { %2555 = vmatpush3.bf16.msra.mxu0 %v1147_v60  ;;  %2556 = vmatprep.mubr.msk.bf16.mxu0 %vm2846_vm2, %v2845_v17 }
 0x4ad   : > { %2566 = vmatprep.subr.bf16.mxu0 %v2845_v17  ;;  %2621 = vmatpush3.bf16.msra.mxu1 %v2731_v59  ;;  %v2435_v59 = vld [vmem:[%s702_s24] ss:$0 sm:$0xff] }
 0x4ae   : > { %2622 = vmatprep.subr.bf16.mxu1 %v2845_v17 }
 0x4c4   : > { %v1137_v62 = vpop.xlane.xlu0 %1136 }
 0x4c5   : > { %2767 = vrcp.f32 %v1137_v62 }
 0x4c8   : > { %v1249_v63 = vpop.xlane.xlu1 %1248  ;;  %v1254_v5 = vpop.permute.xlu0 %1253 }
 0x4c9   : > { %2769 = vrcp.f32 %v1249_v63  ;;  %v1259_v9 = vsel %vm921_vm5, %v1254_v5, 0  ;;  %v2732_v63 = vld [vmem:[%s2996_s23] sm:$0xff]  }
 0x4ca   : > { %2623 = vmatpush3.bf16.msra.mxu1 %v2732_v63 }
 0x4cb   : > { %2636 = vmatprep.subr.bf16.mxu1 %v2845_v17 }
 0x4cc   : > { %v1378_v0 = vpop.xlane.xlu1 %1377 }
 0x4cd   : > { %2771 = vrcp.f32 %v1378_v0 }
 0x4d0   : > { %v1490_v8 = vpop.xlane.xlu1 %1489 }
 0x4d1   : > { %2773 = vrcp.f32 %v1490_v8 }
 0x4d2   : > { %v2768_v1 = vpop.eup %2767 }
 0x4d3   : > { %v1139_v4 = vmul.f32 %v2768_v1, %v2752_v32 }
 0x4d4   : > { %v1495_v18 = vpop.permute.xlu1 %1494 }
 0x4d5   : > { %v1140_v6 = vpack.c.bf16 %v1139_v4, %v1139_v4  ;;  %v1500_v16 = vsel %vm921_vm5, %v1495_v18, 0 }
 0x4d6   : > { %v2770_v7 = vpop.eup %2769 }
 0x4d7   : > { %2557 = vmatmul.mubr.msk.bf16.vlgmr.msra.gmra.mxu0 %vm855_vm3, %v1140_v6  ;;  %v1251_v11 = vmul.f32 %v2770_v7, %v3191_v34 }
 0x4d8   : > { %2567 = vmatpush3.bf16.msra.mxu0 %v1259_v9  ;;  %2568 = vmatprep.mubr.msk.bf16.mxu0 %vm2846_vm2, %v2845_v17 }
 0x4d9   : > { %2578 = vmatprep.subr.bf16.mxu0 %v2845_v17  ;;  %v1252_v12 = vpack.c.bf16 %v1251_v11, %v1251_v11 }
 0x4da   : > { %v2772_v13 = vpop.eup %2771 }
 0x4db   : > { %v1380_v14 = vmul.f32 %v2772_v13, %v3195_v36 }
 0x4dd   : > { %v1381_v19 = vpack.c.bf16 %v1380_v14, %v1380_v14 }
 0x4de   : > { %v2774_v15 = vpop.eup %2773 }
 0x4df   : > { %2569 = vmatmul.mubr.msk.bf16.vlgmr.msra.gmra.mxu0 %vm855_vm3, %v1252_v12  ;;  %v1492_v20 = vmul.f32 %v2774_v15, %v3199_v38 }
 0x4e0   : > { %2579 = vmatpush3.bf16.msra.mxu0 %v1388_v10  ;;  %2580 = vmatprep.mubr.msk.bf16.mxu0 %vm2846_vm2, %v2845_v17 }
 0x4e1   : > { %2590 = vmatprep.subr.bf16.mxu0 %v2845_v17  ;;  %v1493_v21 = vpack.c.bf16 %v1492_v20, %v1492_v20 }
 0x4e7   : > { %2581 = vmatmul.mubr.msk.bf16.vlgmr.msra.gmra.mxu0 %vm855_vm3, %v1381_v19 }
 0x4e8   : > { %2591 = vmatpush3.bf16.msra.mxu0 %v1500_v16  ;;  %2592 = vmatprep.mubr.msk.bf16.mxu0 %vm2846_vm2, %v2845_v17 }
 0x4e9   : > { %2602 = vmatprep.subr.bf16.mxu0 %v2845_v17 }
 0x4ef   : > { %2593 = vmatmul.mubr.msk.bf16.vlgmr.msra.gmra.mxu0 %vm855_vm3, %v1493_v21 }
 0x4f0   : > { %2604 = vmatprep.mubr.msk.bf16.mxu0 %vm2846_vm2, %v2845_v17 }
 0x4f9   : > { %v1602_v22 = vpop.xlane.xlu0 %1601 }
 0x4fa   : > { %2775 = vrcp.f32 %v1602_v22 }
 0x4fd   : > { %v1607_v23 = vpop.permute.xlu0 %1606 }
 0x4fe   : > { %v1612_v24 = vsel %vm921_vm5, %v1607_v23, 0 }
 0x4ff   : > { %2603 = vmatpush3.bf16.msra.mxu0 %v1612_v24 }
 0x500   : > { %2614 = vmatprep.subr.bf16.mxu0 %v2845_v17 }
 0x505   : > { %v1714_v25 = vpop.xlane.xlu1 %1713 }
 0x506   : > { %2777 = vrcp.f32 %v1714_v25 }
 0x507   : > { %v2776_v26 = vpop.eup %2775 }
 0x508   : > { %v1604_v27 = vmul.f32 %v2776_v26, %v3207_v48  ;;  %v2430_v26 = vld [vmem:[%s3418_s22] ss:$0 sm:$0xff]  ;;  %s3421_s22 = sld [smem:[#allocation13_spill]] (!%p2449_p6) }
 0x509   : > { %v1719_v28 = vpop.permute.xlu1 %1718 }
 0x50a   : > { %v1724_v29 = vsel %vm921_vm5, %v1719_v28, 0  ;;  %v1605_v30 = vpack.c.bf16 %v1604_v27, %v1604_v27 }
 0x50c   : > { %2605 = vmatmul.mubr.msk.bf16.vlgmr.msra.gmra.mxu0 %vm855_vm3, %v1605_v30 }
 0x50d   : > { %2615 = vmatpush3.bf16.msra.mxu0 %v1724_v29  ;;  %2616 = vmatprep.mubr.msk.bf16.mxu0 %vm2846_vm2, %v2845_v17 }
 0x50e   : > { %2628 = vmatprep.subr.bf16.mxu0 %v2845_v17 }
 0x513   : > { %v2778_v31 = vpop.eup %2777 }
 0x514   : > { %v1716_v32 = vmul.f32 %v2778_v31, %v3211_v50 }
 0x516   : > { %v1717_v33 = vpack.c.bf16 %v1716_v32, %v1716_v32 }
 0x518   : > { %2617 = vmatmul.mubr.msk.bf16.vlgmr.msra.gmra.mxu0 %vm855_vm3, %v1717_v33 }
 0x519   : > { %2632 = vmatprep.mubr.msk.bf16.mxu0 %vm2846_vm2, %v2845_v17 }
 0x563   : > { %v959_v34 = vpop.f32.mrf.mxu0 }
 0x565   : > { %v2534_v35 = vpop.f32.mrf.mxu0 }
 0x567   : > { %v962_v36 = vpop.f32.mrf.mxu0 }
 0x569   : > { %v2535_v37 = vpop.f32.mrf.mxu0 }
 0x56b   : > { %v1071_v38 = vpop.f32.mrf.mxu0 }
 0x56d   : > { %v2546_v39 = vpop.f32.mrf.mxu0 }
 0x56f   : > { %v1074_v41 = vpop.f32.mrf.mxu0 }
 0x571   : > { %v2547_v42 = vpop.f32.mrf.mxu0 }
 0x597   : > { %v1183_v43 = vpop.f32.mrf.mxu0 }
 0x599   : > { %v2558_v45 = vpop.f32.mrf.mxu0 }
 0x59b   : > { %v1186_v46 = vpop.f32.mrf.mxu0 }
 0x59d   : > { %v2559_v47 = vpop.f32.mrf.mxu0 }
 0x59e   : > { %v2733_v47 = vld [vmem:[%s3013_s3 + $0x8] sm:$0xff]  }
 0x59f   : > { %v1295_v48 = vpop.f32.mrf.mxu0  ;;  %2629 = vmatpush3.bf16.msra.mxu0 %v2733_v47 }
 0x5a0   : > { %2630 = vmatprep.subr.bf16.mxu0 %v2845_v17 }
 0x5a1   : > { %v2570_v49 = vpop.f32.mrf.mxu0 }
 0x5a3   : > { %v1298_v50 = vpop.f32.mrf.mxu0 }
 0x5a5   : > { %v2571_v40 = vpop.f32.mrf.mxu0 }
 0x5a7   : > { %v1424_v51 = vpop.f32.mrf.mxu0 }
 0x5a9   : > { %v2582_v52 = vpop.f32.mrf.mxu0 }
 0x5ab   : > { %v1427_v53 = vpop.f32.mrf.mxu0 }
 0x5ad   : > { %v2583_v54 = vpop.f32.mrf.mxu0 }
 0x5af   : > { %v1536_v55 = vpop.f32.mrf.mxu0 }
 0x5b0   : > { %v2714_v56 = vpack.i.bf16 %v1536_v55, %v1071_v38 }
 0x5b1   : > { %v2594_v57 = vpop.f32.mrf.mxu0 }
 0x5b2   : > { %2715 = vrot.lane.b32.xlu0 %v2714_v56, %s2858_s28  ;;  %v2434_v56 = vld [vmem:[%s699_s13] ss:$0 sm:$0xff] }
 0x5b3   : > { %v1539_v58 = vpop.f32.mrf.mxu0 }
 0x5b5   : > { %v2595_v44 = vpop.f32.mrf.mxu0 }
 0x5cc   : > { %v1648_v60 = vpop.f32.mrf.mxu0 }
 0x5cd   : > { %v2719_v61 = vpack.i.bf16 %v1648_v60, %v1183_v43 }
 0x5ce   : > { %v2606_v62 = vpop.f32.mrf.mxu0 }
 0x5cf   : > { %2720 = vrot.lane.b32.xlu1 %v2719_v61, %s2859_s16 }
 0x5d0   : > { %v1651_v0 = vpop.f32.mrf.mxu0 }
 0x5d1   : > { %v2735_v0 = vld [vmem:[%s3023_s30 + $0x38] sm:$0xff]  }
 0x5d2   : > { %v2607_v1 = vpop.f32.mrf.mxu0 }
 0x5d3   : > { %v2736_v1 = vld [vmem:[%s3023_s30 + $0x30] sm:$0xff]  }
 0x5d8   : > { %v1760_v4 = vpop.f32.mrf.mxu0 }
 0x5d9   : > { %v2724_v5 = vpack.i.bf16 %v1760_v4, %v1295_v48  ;;  %v2734_v48 = vld [vmem:[%s3013_s3] sm:$0xff]   ;;  %v2737_v4 = vld [vmem:[%s3023_s30 + $0x28] sm:$0xff]  }
 0x5da   : > { %v2618_v6 = vpop.f32.mrf.mxu0  ;;  %2631 = vmatpush3.bf16.msra.mxu0 %v2734_v48 }
 0x5db   : > { %2725 = vrot.lane.b32.xlu0 %v2724_v5, %s2860_s15  ;;  %v2738_v5 = vld [vmem:[%s3023_s30 + $0x20] sm:$0xff]   ;;  %v2739_v6 = vld [vmem:[%s3023_s30 + $0x18] sm:$0xff]   ;;  %s3420_s15 = sld [smem:[#allocation12_spill]] (!%p2449_p6) }
 0x5dc   : > { %v1763_v7 = vpop.f32.mrf.mxu0 }
 0x5dd   : > { %v2740_v7 = vld [vmem:[%s3023_s30 + $0x10] sm:$0xff]  }
 0x5de   : > { %v2619_v8 = vpop.f32.mrf.mxu0 }
 0x5df   : > { %v2741_v8 = vld [vmem:[%s3023_s30 + $0x8] sm:$0xff]  }
 0x624   : > { %v2716_v9 = vpop.permute.xlu0 %2715 }
 0x625   : > { %v2718_v12 = vunpack.i.h.bf16 %v2716_v9  ;;  %v2717_v13 = vunpack.i.l.bf16 %v2716_v9  ;;  %v2742_v9 = vld [vmem:[%s3023_s30] sm:$0xff]  }
 0x627   : > { %v1778_v19 = vsel %vm855_vm3, %v1424_v51, %v2718_v12  ;;  %v1313_v15 = vsel %vm855_vm3, %v959_v34, %v2717_v13 }
 0x641   : > { %v2721_v11 = vpop.permute.xlu1 %2720 }
 0x642   : > { %v2723_v10 = vunpack.i.h.bf16 %v2721_v11  ;;  %v2722_v14 = vunpack.i.l.bf16 %v2721_v11  ;;  %v2436_v11 = vld [vmem:[%s710_s5] ss:$0 sm:$0xff] }
 0x644   : > { %v1779_v21 = vsel %vm1314_vm6, %v1778_v19, %v2723_v10  ;;  %v1315_v22 = vsel %vm1314_vm6, %v1313_v15, %v2722_v14 }
 0x64d   : > { %v2726_v18 = vpop.permute.xlu0 %2725 }
 0x64e   : > { %v2728_v16 = vunpack.i.h.bf16 %v2726_v18  ;;  %v2727_v20 = vunpack.i.l.bf16 %v2726_v18 }
 0x650   : > { %v1780_v23 = vsel %vm1316_vm7, %v1779_v21, %v2728_v16  ;;  %v1317_v24 = vsel %vm1316_vm7, %v1315_v22, %v2727_v20 }
 0x651   : > { %v1781_v25 = vpack.c.bf16 %v1780_v23, %v1317_v24 }
 0x653   : > { %2625 = vmatmul.mubr.msk.bf16.vlgmr.msra.gmra.mxu1 %vm734_vm1, %v1781_v25 }
 0x654   : > { %2652 = vmatprep.mubr.msk.bf16.mxu1 %vm2846_vm2, %v2845_v17  ;;  %2637 = vmatpush3.bf16.msra.mxu1 %v2735_v0 }
 0x655   : > { %2638 = vmatprep.subr.bf16.mxu1 %v2845_v17 }
 0x658   : > { %2639 = vmatpush3.bf16.msra.mxu1 %v2736_v1 }
 0x659   : > { %2640 = vmatprep.subr.bf16.mxu1 %v2845_v17 }
 0x65c   : > { %2641 = vmatpush3.bf16.msra.mxu1 %v2737_v4 }
 0x65d   : > { %2642 = vmatprep.subr.bf16.mxu1 %v2845_v17 }
 0x660   : > { %2643 = vmatpush3.bf16.msra.mxu1 %v2738_v5 }
 0x661   : > { %2644 = vmatprep.subr.bf16.mxu1 %v2845_v17 }
 0x664   : > { %2645 = vmatpush3.bf16.msra.mxu1 %v2739_v6 }
 0x665   : > { %2646 = vmatprep.subr.bf16.mxu1 %v2845_v17 }
 0x668   : > { %2647 = vmatpush3.bf16.msra.mxu1 %v2740_v7 }
 0x669   : > { %2648 = vmatprep.subr.bf16.mxu1 %v2845_v17 }
 0x66c   : > { %2649 = vmatpush3.bf16.msra.mxu1 %v2741_v8 }
 0x66d   : > { %2650 = vmatprep.subr.bf16.mxu1 %v2845_v17 }
 0x670   : > { %2651 = vmatpush3.bf16.msra.mxu1 %v2742_v9 }
 0x713   : > { %v1842_v27 = vpop.f32.mrf.mxu1 }
 0x714   : > { %v1843_v28 = vadd.f32 %v2430_v26, %v1842_v27 }
 0x715   : > { %v2626_v29 = vpop.f32.mrf.mxu1 }
 0x716   : > { %v3278_v30 = vadd.f32 %v1843_v28, %v3036_v2 }
 0x717   : > { %v1845_v31 = vpop.f32.mrf.mxu1 }
 0x718   : > { %v1846_v32 = vadd.f32 %v2430_v26, %v1845_v31  ;;  %v1853_v33 = vsel %vm734_vm1, %v3278_v30, 0.0 }
 0x719   : > { %1854 = vadd.xlane.f32.xlu1 %v1853_v33  ;;  %v2627_v34 = vpop.f32.mrf.mxu1 }
 0x71a   : > { %v3283_v35 = vadd.f32 %v1846_v32, %v3038_v3 }
 0x71c   : > { %v1856_v36 = vsel %vm734_vm1, %v3283_v35, 0.0 }
 0x71d   : > { %1857 = vadd.xlane.f32.xlu0 %v1856_v36 }
 0x7a2   : > { %v1855_v37 = vpop.xlane.xlu1 %1854 }
 0x7a3   : > { %v1859_v38 = vmul.f32 0.03125, %v1855_v37 }
 0x7a5   : > { %v1861_v2 = vsub.f32 %v3278_v30, %v1859_v38  ;;  %v2440_v38 = vld [vmem:[%s718_s19] ss:$0 sm:$0xff]  ;;  %s3419_s19 = sld [smem:[#allocation14_spill]] (!%p2449_p6) }
 0x7a6   : > { %v1858_v39 = vpop.xlane.xlu0 %1857 }
 0x7a7   : > { %v1860_v41 = vmul.f32 0.03125, %v1858_v39  ;;  %v1863_v42 = vmul.f32 %v1861_v2, %v1861_v2 }
 0x7a9   : > { %v1862_v43 = vsub.f32 %v3283_v35, %v1860_v41  ;;  %v1865_v45 = vsel %vm734_vm1, %v1863_v42, 0.0 }
 0x7aa   : > { %1866 = vadd.xlane.f32.xlu0 %v1865_v45 }
 0x7ab   : > { %v1864_v46 = vmul.f32 %v1862_v43, %v1862_v43 }
 0x7ad   : > { %v1868_v3 = vsel %vm734_vm1, %v1864_v46, 0.0 }
 0x7ae   : > { %1869 = vadd.xlane.f32.xlu0 %v1868_v3 }
 0x833   : > { %v1867_v49 = vpop.xlane.xlu0 %1866 }
 0x834   : > { %v1871_v50 = vmul.f32 0.03125, %v1867_v49 }
 0x836   : > { %v1873_v40 = vadd.f32 1e-05, %v1871_v50 }
 0x837   : > { %v1870_v51 = vpop.xlane.xlu0 %1869 }
 0x838   : > { %2779 = vrsqrt.f32 %v1873_v40  ;;  %v1872_v52 = vmul.f32 0.03125, %v1870_v51 }
 0x83a   : > { %v1874_v53 = vadd.f32 1e-05, %v1872_v52 }
 0x83c   : > { %2781 = vrsqrt.f32 %v1874_v53 }
 0x845   : > { %v2780_v54 = vpop.eup %2779 }
 0x846   : > { %v1877_v55 = vmul.f32 %v2780_v54, %v1861_v2 }
 0x848   : > { %v1885_v44 = vmul.f32 %v2434_v56, %v1877_v55 }
 0x849   : > { %v2782_v57 = vpop.eup %2781 }
 0x84a   : > { %v1878_v58 = vmul.f32 %v2782_v57, %v1862_v43  ;;  %v1893_v61 = vadd.f32 %v2435_v59, %v1885_v44 }
 0x84c   : > { %v1886_v60 = vmul.f32 %v2434_v56, %v1878_v58 }
 0x84e   : > { %v1894_v62 = vadd.f32 %v2435_v59, %v1886_v60 }
 0x850   : > { %v1895_v63 = vpack.c.bf16 %v1894_v62, %v1893_v61 }
 0x852   : > { %2633 = vmatmul.mubr.msk.bf16.vlgmr.msra.gmra.mxu0 %vm734_vm1, %v1895_v63 }
 0x912   : > { %v1956_v12 = vpop.f32.mrf.mxu0 }
 0x913   : > { %v1957_v13 = vadd.f32 %v2436_v11, %v1956_v12 }
 0x914   : > { %v2634_v10 = vpop.f32.mrf.mxu0 }
 0x915   : > { %v1965_v14 = vmul.f32 %v1957_v13, %v1957_v13  ;;  %v1963_v31 = vmul.f32 0.5, %v1957_v13 }
 0x916   : > { %v1959_v18 = vpop.f32.mrf.mxu0 }
 0x917   : > { %v1967_v19 = vmul.f32 %v1965_v14, %v1957_v13  ;;  %v1960_v15 = vadd.f32 %v2436_v11, %v1959_v18 }
 0x918   : > { %v2635_v16 = vpop.f32.mrf.mxu0 }
 0x919   : > { %v1969_v20 = vmul.f32 0.044715, %v1967_v19  ;;  %v1966_v21 = vmul.f32 %v1960_v15, %v1960_v15  ;;  %v1964_v32 = vmul.f32 0.5, %v1960_v15 }
 0x91b   : > { %v1971_v22 = vadd.f32 %v1969_v20, %v1957_v13  ;;  %v1968_v23 = vmul.f32 %v1966_v21, %v1960_v15 }
 0x91d   : > { %v1973_v24 = vmul.f32 0.7978846, %v1971_v22  ;;  %v1970_v17 = vmul.f32 0.044715, %v1968_v23 }
 0x91f   : > { %2783 = vtanh.f32 %v1973_v24  ;;  %v1972_v25 = vadd.f32 %v1970_v17, %v1960_v15 }
 0x921   : > { %v1974_v26 = vmul.f32 0.7978846, %v1972_v25 }
 0x923   : > { %2785 = vtanh.f32 %v1974_v26 }
 0x92c   : > { %v2784_v27 = vpop.eup %2783 }
 0x92d   : > { %v1977_v28 = vadd.f32 1.0, %v2784_v27 }
 0x92f   : > { %v1979_v34 = vmul.f32 %v1977_v28, %v1963_v31 }
 0x930   : > { %v2786_v29 = vpop.eup %2785 }
 0x931   : > { %v1978_v33 = vadd.f32 1.0, %v2786_v29 }
 0x933   : > { %v1980_v36 = vmul.f32 %v1978_v33, %v1964_v32 }
 0x935   : > { %v1981_v37 = vpack.c.bf16 %v1980_v36, %v1979_v34 }
 0x937   : > { %2653 = vmatmul.mubr.bf16.vlgmr.msra.gmra.mxu1 %v1981_v37 }
 0x9f7   : > { %v2087_v2 = vpop.f32.mrf.mxu1 }
 0x9f8   : > { %v2088_v39 = vadd.f32 %v2440_v38, %v2087_v2 }
 0x9f9   : > { %v2654_v41 = vpop.f32.mrf.mxu1 }
 0x9fa   : > { %v2094_v42 = vadd.f32 %v2088_v39, %v3278_v30 }
 0x9fb   : > { %v2090_v43 = vpop.f32.mrf.mxu1 }
 0x9fc   : > { %2096 = vst.msk [vmem:[#allocation2] sm:$0xff] %vm734_vm1, %v2094_v42  ;;  %v2091_v45 = vadd.f32 %v2440_v38, %v2090_v43  ;;  %2101 = sbr.rel (%p2449_p6) target bundleno = 3074 (0xc02), region = 92 }
 0x9fd   : > { %v2655_v46 = vpop.f32.mrf.mxu1 }
 0x9fe   : > { %v2095_v3 = vadd.f32 %v2091_v45, %v3283_v35 }
 0xa00   : > { %2097 = vst.msk [vmem:[#allocation2 + $0x8] sm:$0xff] %vm734_vm1, %v2095_v3 }
 0xa01   : > { %v2104_v47 = vsel %vm734_vm1, %v2094_v42, 0.0  ;;  %v2107_v48 = vsel %vm734_vm1, %v2095_v3, 0.0  ;;  %v2787_v56 = vld [vmem:[%s3419_s19 + $0x8] sm:$0xff]   ;;  %v2861_v57 = vmov 0.0   ;;  %vm2862_vm8 = vmmov 0   ;;  %v2788_v58 = vld [vmem:[%s3419_s19] sm:$0xff]  }
 0xa02   : > { %2105 = vadd.xlane.f32.xlu0 %v2104_v47  ;;  %2656 = vmatprep.subr.bf16.mxu0 %v2861_v57  ;;  %v2450_v4 = vld [vmem:[%s3420_s15] ss:$0 sm:$0xff] }
 0xa03   : > { %2660 = vmatprep.mubr.msk.bf16.mxu0 %vm2862_vm8, %v2861_v57  ;;  %2657 = vmatpush3.bf16.msra.mxu0 %v2787_v56  ;;  %v2451_v8 = vld [vmem:[%s3421_s22] ss:$0 sm:$0xff] }
 0xa04   : > { %2658 = vmatprep.subr.bf16.mxu0 %v2861_v57 }
 0xa06   : > { %2108 = vadd.xlane.f32.xlu0 %v2107_v48 }
 0xa07   : > { %2659 = vmatpush3.bf16.msra.mxu0 %v2788_v58 }
 0xa8b   : > { %v2106_v49 = vpop.xlane.xlu0 %2105 }
 0xa8c   : > { %v2110_v30 = vmul.f32 0.03125, %v2106_v49 }
 0xa8e   : > { %v2112_v50 = vsub.f32 %v2094_v42, %v2110_v30 }
 0xa8f   : > { %v2109_v40 = vpop.xlane.xlu0 %2108 }
 0xa90   : > { %v2111_v51 = vmul.f32 0.03125, %v2109_v40  ;;  %v2114_v52 = vmul.f32 %v2112_v50, %v2112_v50 }
 0xa92   : > { %v2113_v53 = vsub.f32 %v2095_v3, %v2111_v51  ;;  %v2116_v35 = vsel %vm734_vm1, %v2114_v52, 0.0 }
 0xa93   : > { %2117 = vadd.xlane.f32.xlu1 %v2116_v35 }
 0xa94   : > { %v2115_v54 = vmul.f32 %v2113_v53, %v2113_v53 }
 0xa96   : > { %v2119_v55 = vsel %vm734_vm1, %v2115_v54, 0.0 }
 0xa97   : > { %2120 = vadd.xlane.f32.xlu1 %v2119_v55 }
 0xb1c   : > { %v2118_v44 = vpop.xlane.xlu1 %2117 }
 0xb1d   : > { %v2122_v59 = vmul.f32 0.03125, %v2118_v44 }
 0xb1f   : > { %v2124_v60 = vadd.f32 1e-05, %v2122_v59 }
 0xb20   : > { %v2121_v61 = vpop.xlane.xlu1 %2120 }
 0xb21   : > { %2789 = vrsqrt.f32 %v2124_v60  ;;  %v2123_v62 = vmul.f32 0.03125, %v2121_v61 }
 0xb23   : > { %v2125_v63 = vadd.f32 1e-05, %v2123_v62 }
 0xb25   : > { %2791 = vrsqrt.f32 %v2125_v63 }
 0xb2e   : > { %v2790_v0 = vpop.eup %2789 }
 0xb2f   : > { %v2128_v1 = vmul.f32 %v2790_v0, %v2112_v50 }
 0xb31   : > { %v2136_v7 = vmul.f32 %v2450_v4, %v2128_v1 }
 0xb32   : > { %v2792_v5 = vpop.eup %2791 }
 0xb33   : > { %v2129_v6 = vmul.f32 %v2792_v5, %v2113_v53  ;;  %v2144_v11 = vadd.f32 %v2451_v8, %v2136_v7 }
 0xb35   : > { %v2137_v9 = vmul.f32 %v2450_v4, %v2129_v6 }
 0xb37   : > { %v2145_v12 = vadd.f32 %v2451_v8, %v2137_v9 }
 0xb39   : > { %v2146_v13 = vpack.c.bf16 %v2145_v12, %v2144_v11 }
 0xb3b   : > { %2661 = vmatmul.mubr.msk.bf16.vlgmr.msra.gmra.mxu0 %vm734_vm1, %v2146_v13 }
 0xbfb   : > { %v2200_v10 = vpop.f32.mrf.mxu0 }
 0xbfc   : > { %2207 = vst [vmem:[#allocation3] sm:$0xff] %v2200_v10 }
 0xbfd   : > { %v2662_v14 = vpop.f32.mrf.mxu0 }
 0xbff   : > { %v2203_v18 = vpop.f32.mrf.mxu0 }
 0xc00   : > { %2208 = vst [vmem:[#allocation3 + $0x8] sm:$0xff] %v2203_v18 }
 0xc01   : > { %v2663_v19 = vpop.f32.mrf.mxu0 }
 0xc02 PF: > { %s3422_s14 = sld [smem:[#allocation7_spill]]  ;;  %s2863_s17 = smov [#allocation3]  }
 0xc03   : > { %s2218_s13 = sshll.u32 %s2863_s17, 4  ;;  %s2219_s13 = int_to_ptr.vmem [resolvable:$true] %s2218_s13 }
 0xc04   : > { %s2793_s24 = scalar_lea.vmem %s2219_s13, 256  ;;  %p2800_p11 = scmp.lt.s32.totalorder %s2219_s13, %s2219_s13 }
 0xc05   : > { %p2794_p8 = scmp.ne.s32.totalorder %s2219_s13, %s2793_s24  ;;  %p2801_p12 = scmp.lt.s32.totalorder %s2793_s24, %s2793_s24 }
 0xc07   : > { %p2802_p13 = por %p2801_p12, %p2800_p11 }
 0xc08   : > { %s3423_s29 = sadd.s32 4294967295, %s3422_s14  }
 0xc09   : > { %p3354_p7 = scmp.eq.s32.totalorder %s3423_s29, 1 }
 0xc0b   : > { %p2795_p9 = pnand %p2794_p8, %p3354_p7 }
 0xc0d   : > { %p2796_p10 = pneg %p2795_p9 }
 0xc0f   : > { %p2803_p0 = pnand %p2802_p13, %p2796_p10 }
 0xc11   : > { %2806 = shalt.err (!%p2803_p0)
}
 0xc12   : > { %s2864_s5 = smov 128   ;;  %s3425_s26 = sld [smem:[#allocation15_spill]] }
 0xc18   : > { %2665 = dma.vmem_to_hbm [thread:$0]  (%p3354_p7), %s2219_s13, 256, %s3425_s26, [#allocation4], %s2864_s5, %s2864_s5, %s2858_s28  }
 0xc19   : > { %2830 = dma.done.wait (%p3354_p7), [#allocation4], 256  }
 0xc1a   : > { %2832 = vsyncadd (%p3354_p7), [#allocation4], 4294967040 }
 0xc1b PF: > { %s3426_s0 = sld [smem:[#allocation7_spill]] }
 0xc1c   : > { %s3427_s21 = sld [smem:[#allocation6_spill]] }
 0xc1d   : > { %s3428_s22 = sld [smem:[#allocation8_spill]] }
 0xc21   : > { %s27_s23 = sadd.s32 1, %s3426_s0  }
 0xc22   : > { %p24_p1 = scmp.ge.s32.totalorder %s27_s23, 4  }
 0xc24   :  { %26 = sbr.rel (!%p24_p1) target bundleno = 10 (0xa), region = 156 }
 0xc29   :  { %2234 = vsyncpa [#allocation4], 1 }
 0xc2a   :  { %2236 = vsyncpa [#allocation4 + $0x1], 1 }

</bundles_post_ra>
